<compile_context>
chip_gen: v5e
topology: v5e:2x2
jax: 0.10.0
libtpu: 0.0.40
codegen_flags: <defaults>
</compile_context>

<pallas_src>
import functools

import jax
import jax.numpy as jnp
from jax.experimental import pallas as pl
from jax.experimental.pallas import tpu as pltpu


# ---------------------------------------------------------------------------
# Kernel
# ---------------------------------------------------------------------------

def _qwen3_mlp_kernel(x_ref, wgu_ref, wd_ref, o_ref, acc_ref, *, ti):
    """One (token-tile i, I-slab k) grid step of the SiLU-gated MLP.

    x_ref:   (tm, H)      token tile (resident across the reduction axis)
    wgu_ref: (H, 2*ti)    merged [gate | up] weight slab (pre-blocked, contiguous)
    wd_ref:  (ti, H)      down-proj weight slab
    o_ref:   (tm, H)      output tile
    acc_ref: (tm, H) f32  accumulator scratch
    """
    k = pl.program_id(1)

    @pl.when(k == 0)
    def _():
        acc_ref[...] = jnp.zeros_like(acc_ref)

    x = x_ref[...]

    # Single merged matmul for gate+up; the split at `ti` is lane-aligned
    # (ti is a multiple of 128) so the slices are free (no relayout).
    gu = jnp.dot(x, wgu_ref[...], preferred_element_type=jnp.float32)  # (tm, 2*ti)
    gate = gu[:, :ti]
    up = gu[:, ti:]

    # SiluAndMul: silu(gate) * up  (sigmoid goes to the EUP slot).
    act = (gate * jax.nn.sigmoid(gate)) * up

    # Partial down_proj for this I-slab, accumulated in f32.
    acc_ref[...] += jnp.dot(act.astype(wd_ref.dtype), wd_ref[...],
                            preferred_element_type=jnp.float32)

    @pl.when(k == pl.num_programs(1) - 1)
    def _():
        o_ref[...] = acc_ref[...].astype(o_ref.dtype)


# ---------------------------------------------------------------------------
# Tiling / VMEM-budget selection
# ---------------------------------------------------------------------------

def _vmem_budget():
    """(scoped vmem limit, tiling budget) derived from physical VMEM per core."""
    try:
        cap = int(pltpu.get_tpu_info().vmem_capacity_bytes)
    except Exception:
        cap = 64 * 1024 * 1024  # conservative fallback (v7x per-TC size)
    # ~25% headroom for compiler-internal scratch/semaphores; never ask >100 MiB.
    vmem_limit = min((cap * 3) // 4, 100 * 1024 * 1024)  # ~48 MiB v7x, ~96 MiB v5e/v6e
    budget = vmem_limit - 6 * 1024 * 1024
    return vmem_limit, budget


def _select_ti(inter, max_ti=512):
    """Largest multiple of 128 that divides I, capped at max_ti (ti does not change
    arithmetic intensity, so it is capped to leave VMEM for tm)."""
    best = min(inter, 128)
    t = 128
    while t <= min(inter, max_ti):
        if inter % t == 0:
            best = t
        t += 128
    return best


def _vmem_step_bytes(tm, ti, hidden, w_bytes, out_bytes):
    return (2 * 3 * hidden * ti * w_bytes   # double-buffered weight slabs (merged 2*ti + down ti)
            + 2 * tm * hidden * w_bytes     # x tile, double-buffered
            + 2 * tm * hidden * out_bytes   # out tile, double-buffered
            + tm * hidden * 4               # f32 accumulator scratch
            + 3 * tm * ti * 4)              # f32 gate/up/act intermediates


def _select_tm(tokens, hidden, ti, w_bytes, out_bytes, budget, max_tm=1024):
    """tm is the FLOPs-per-streamed-weight-byte knob: maximize under the VMEM
    budget; no point exceeding the padded token count."""
    tm_cap = min(max_tm, max(128, pl.cdiv(tokens, 128) * 128))
    best = 128
    tm = 128
    while tm <= tm_cap:
        if _vmem_step_bytes(tm, ti, hidden, w_bytes, out_bytes) <= budget:
            best = tm
        tm += 128
    return best


# ---------------------------------------------------------------------------
# Load-time weight preparation (split + transpose + cast + contiguous pre-block)
# ---------------------------------------------------------------------------

def prepare_qwen3_mlp_weights(w_gate_up, w_down, *, ti=None, dtype=jnp.bfloat16):
    """One-time prep of PyTorch nn.Linear-layout weights.

    w_gate_up: [2*I, H]  (rows 0..I-1 = gate, rows I..2I-1 = up)
    w_down:    [H, I]

    Returns:
      wgu:  (I//ti, H, 2*ti)  contiguous merged [gate|up] slabs (long DMA bursts)
      wd_t: (I, H)            transposed down-proj weight (I-slabs are contiguous)
    """
    two_i, hidden = w_gate_up.shape
    inter = two_i // 2
    assert w_down.shape == (hidden, inter)
    assert hidden % 128 == 0 and inter % 128 == 0

    if ti is None:
        ti = _select_ti(inter)
    assert ti % 128 == 0 and inter % ti == 0
    k_steps = inter // ti

    wg_t = jnp.asarray(w_gate_up[:inter].T, dtype=dtype)          # (H, I)
    wu_t = jnp.asarray(w_gate_up[inter:].T, dtype=dtype)          # (H, I)
    wg_b = wg_t.reshape(hidden, k_steps, ti).transpose(1, 0, 2)   # (K, H, ti)
    wu_b = wu_t.reshape(hidden, k_steps, ti).transpose(1, 0, 2)   # (K, H, ti)
    wgu = jnp.concatenate([wg_b, wu_b], axis=-1)                  # (K, H, 2*ti)
    wd_t = jnp.asarray(w_down.T, dtype=dtype)                     # (I, H)
    return wgu, wd_t


# ---------------------------------------------------------------------------
# Forward
# ---------------------------------------------------------------------------

@functools.partial(jax.jit, static_argnames=("tm",))
def qwen3_mlp_forward(x, wgu, wd_t, *, tm=None):
    """Fused Qwen3 MLP: down_proj( silu(x @ Wg^T) * (x @ Wu^T) ).

    x:    [T, H]
    wgu:  [I//ti, H, 2*ti]  (from prepare_qwen3_mlp_weights)
    wd_t: [I, H]
    """
    tokens, hidden = x.shape
    k_steps, hidden_w, two_ti = wgu.shape
    ti = two_ti // 2
    inter = k_steps * ti
    assert hidden_w == hidden
    assert wd_t.shape == (inter, hidden)

    w_bytes = jnp.dtype(wgu.dtype).itemsize
    out_dtype = x.dtype
    out_bytes = jnp.dtype(out_dtype).itemsize

    vmem_limit, budget = _vmem_budget()
    if tm is None:
        tm = _select_tm(tokens, hidden, ti, w_bytes, out_bytes, budget)

    # Pad the token axis to a multiple of tm; padded rows are zeros, stay exact
    # zeros through silu(gate)*up and the down-proj accumulator, and are sliced off.
    tokens_p = pl.cdiv(tokens, tm) * tm
    x_p = x if tokens_p == tokens else jnp.pad(x, ((0, tokens_p - tokens), (0, 0)))
    x_p = x_p.astype(wgu.dtype)

    grid = (tokens_p // tm, k_steps)

    cost = pl.CostEstimate(
        flops=6 * tokens_p * hidden * inter,
        transcendentals=tokens_p * inter,
        bytes_accessed=(tokens_p * hidden * (w_bytes + out_bytes)
                        + grid[0] * 3 * hidden * inter * w_bytes),
    )

    out = pl.pallas_call(
        functools.partial(_qwen3_mlp_kernel, ti=ti),
        out_shape=jax.ShapeDtypeStruct((tokens_p, hidden), out_dtype),
        grid_spec=pltpu.PrefetchScalarGridSpec(
            num_scalar_prefetch=0,
            grid=grid,
            in_specs=[
                pl.BlockSpec((tm, hidden), lambda i, k: (i, 0)),         # x tile
                pl.BlockSpec((pl.Squeezed(), hidden, two_ti),
                             lambda i, k: (k, 0, 0)),                    # merged [gate|up] slab
                pl.BlockSpec((ti, hidden), lambda i, k: (k, 0)),         # down-proj slab
            ],
            out_specs=pl.BlockSpec((tm, hidden), lambda i, k: (i, 0)),
            scratch_shapes=[pltpu.VMEM((tm, hidden), jnp.float32)],
        ),
        compiler_params=pltpu.CompilerParams(
            dimension_semantics=("parallel", "arbitrary"),
            vmem_limit_bytes=vmem_limit,
        ),
        cost_estimate=cost,
    )(x_p, wgu, wd_t)

    return out[:tokens]


# ---------------------------------------------------------------------------
# Pure-JAX reference (same cast points as the kernel)
# ---------------------------------------------------------------------------

def ref_qwen3_mlp(x, w_gate_up, w_down, w_dtype, out_dtype):
    inter = w_gate_up.shape[0] // 2
    xf = x.astype(w_dtype).astype(jnp.float32)
    wg = jnp.asarray(w_gate_up[:inter], dtype=w_dtype).astype(jnp.float32)
    wu = jnp.asarray(w_gate_up[inter:], dtype=w_dtype).astype(jnp.float32)
    wd = jnp.asarray(w_down, dtype=w_dtype).astype(jnp.float32)
    gate = xf @ wg.T
    up = xf @ wu.T
    act = (gate * jax.nn.sigmoid(gate)) * up
    act = act.astype(w_dtype).astype(jnp.float32)
    out = act @ wd.T
    return out.astype(out_dtype)


if __name__ == "__main__":
    hidden_size = 256
    intermediate_size = 512
    num_tokens = 200          # deliberately not a multiple of 128 (padding path)

    key = jax.random.PRNGKey(0)
    kx, kg, kd = jax.random.split(key, 3)

    x = jax.random.normal(kx, (num_tokens, hidden_size), dtype=jnp.float32)
    # Synthetic weights in PyTorch nn.Linear layout [out_features, in_features].
    w_gate_up = jax.random.normal(
        kg, (2 * intermediate_size, hidden_size), dtype=jnp.float32) * 0.02
    w_down = jax.random.normal(
        kd, (hidden_size, intermediate_size), dtype=jnp.float32) * 0.02

    x_bf16 = x.astype(jnp.bfloat16)
    ref = ref_qwen3_mlp(x_bf16, w_gate_up, w_down, jnp.bfloat16, jnp.bfloat16)

    # (1) Explicit small tiles: ti=256 -> 2 reduction steps (exercises the
    #     accumulator init/finalize), tm=128 -> 2 token tiles + padding.
    wgu, wd_t = prepare_qwen3_mlp_weights(w_gate_up, w_down, ti=256)
    out1 = jax.block_until_ready(qwen3_mlp_forward(x_bf16, wgu, wd_t, tm=128))
    assert out1.shape == (num_tokens, hidden_size)
    assert jnp.allclose(out1.astype(jnp.float32), ref.astype(jnp.float32),
                        atol=1e-2, rtol=2e-2)

    # (2) Auto tile selection (ti and tm derived from the VMEM budget + token count).
    wgu2, wd_t2 = prepare_qwen3_mlp_weights(w_gate_up, w_down)
    out2 = jax.block_until_ready(qwen3_mlp_forward(x_bf16, wgu2, wd_t2))
    assert out2.shape == (num_tokens, hidden_size)
    assert jnp.allclose(out2.astype(jnp.float32), ref.astype(jnp.float32),
                        atol=1e-2, rtol=2e-2)

    print("KERNEL_OK")
</pallas_src>

<mosaic_0001>
module attributes {stable_mosaic.version = 11 : i64} {
  func.func @_qwen3_mlp_kernel(%arg0: i32, %arg1: i32, %arg2: memref<128x256xbf16, #tpu.memory_space<vmem>>, %arg3: memref<1x256x512xbf16, #tpu.memory_space<vmem>>, %arg4: memref<256x256xbf16, #tpu.memory_space<vmem>>, %arg5: memref<128x256xbf16, #tpu.memory_space<vmem>>, %arg6: memref<128x256xf32, #tpu.memory_space<vmem>>) attributes {dimension_semantics = [#tpu.dimension_semantics<parallel>, #tpu.dimension_semantics<arbitrary>], iteration_bounds = array<i64: 2, 2>, scalar_prefetch = 0 : i64, scratch_operands = 1 : i64, tpu.core_type = #tpu.core_type<tc>, window_params = [{transform_indices = @transform_0, window_bounds = array<i64: 128, 256>}, {transform_indices = @transform_1, window_bounds = array<i64: 1, 256, 512>}, {transform_indices = @transform_2, window_bounds = array<i64: 256, 256>}, {transform_indices = @transform_3, window_bounds = array<i64: 128, 256>}]} {
    %c0_i32 = arith.constant 0 : i32
    %0 = arith.cmpi eq, %arg1, %c0_i32 : i32
    %1 = arith.extui %0 : i1 to i32
    %c0_i32_0 = arith.constant 0 : i32
    %2 = arith.cmpi ne, %1, %c0_i32_0 : i32
    scf.if %2 {
      %cst_14 = arith.constant 0.000000e+00 : f32
      %25 = vector.broadcast %cst_14 : f32 to vector<128x256xf32>
      %c0_15 = arith.constant 0 : index
      %c0_16 = arith.constant 0 : index
      %26 = vector.load %arg6[%c0_15, %c0_16] : memref<128x256xf32, #tpu.memory_space<vmem>>, vector<128x256xf32>
      tpu.vector_store %arg6[%c0_15, %c0_16], %25 {strides = array<i32>} : memref<128x256xf32, #tpu.memory_space<vmem>>, vector<128x256xf32>,
    } else {
    }
    %c0 = arith.constant 0 : index
    %c0_1 = arith.constant 0 : index
    %3 = vector.load %arg2[%c0, %c0_1] : memref<128x256xbf16, #tpu.memory_space<vmem>>, vector<128x256xbf16>
    %c0_2 = arith.constant 0 : index
    %c0_3 = arith.constant 0 : index
    %c0_4 = arith.constant 0 : index
    %4 = vector.load %arg3[%c0_2, %c0_3, %c0_4] : memref<1x256x512xbf16, #tpu.memory_space<vmem>>, vector<1x256x512xbf16>
    %5 = vector.shape_cast %4 : vector<1x256x512xbf16> to vector<256x512xbf16>
    %cst = arith.constant dense<0.000000e+00> : vector<128x512xf32>
    %6 = tpu.matmul %3, %5, %cst {dimension_numbers = #tpu.dot_dimension_numbers<[1], [0], [0], [1], [0, 0, 1, 1], [], []>} : vector<128x256xbf16>, vector<256x512xbf16>, vector<128x512xf32> -> vector<128x512xf32>
    %7 = vector.extract_strided_slice %6 {offsets = [0, 0], sizes = [128, 256], strides = [1, 1]} : vector<128x512xf32> to vector<128x256xf32>
    %8 = vector.extract_strided_slice %6 {offsets = [0, 256], sizes = [128, 256], strides = [1, 1]} : vector<128x512xf32> to vector<128x256xf32>
    %9 = arith.negf %7 : vector<128x256xf32>
    %10 = math.exp %9 : vector<128x256xf32>
    %cst_5 = arith.constant 1.000000e+00 : f32
    %11 = vector.broadcast %cst_5 : f32 to vector<128x256xf32>
    %12 = arith.addf %11, %10 : vector<128x256xf32>
    %13 = arith.divf %11, %12 : vector<128x256xf32>
    %14 = arith.mulf %7, %13 : vector<128x256xf32>
    %15 = arith.mulf %14, %8 : vector<128x256xf32>
    %c0_6 = arith.constant 0 : index
    %c0_7 = arith.constant 0 : index
    %16 = vector.load %arg6[%c0_6, %c0_7] : memref<128x256xf32, #tpu.memory_space<vmem>>, vector<128x256xf32>
    %17 = arith.truncf %15 : vector<128x256xf32> to vector<128x256xbf16>
    %c0_8 = arith.constant 0 : index
    %c0_9 = arith.constant 0 : index
    %18 = vector.load %arg4[%c0_8, %c0_9] : memref<256x256xbf16, #tpu.memory_space<vmem>>, vector<256x256xbf16>
    %cst_10 = arith.constant dense<0.000000e+00> : vector<128x256xf32>
    %19 = tpu.matmul %17, %18, %cst_10 {dimension_numbers = #tpu.dot_dimension_numbers<[1], [0], [0], [1], [0, 0, 1, 1], [], []>} : vector<128x256xbf16>, vector<256x256xbf16>, vector<128x256xf32> -> vector<128x256xf32>
    %20 = arith.addf %16, %19 : vector<128x256xf32>
    %c0_11 = arith.constant 0 : index
    %c0_12 = arith.constant 0 : index
    %21 = vector.load %arg6[%c0_11, %c0_12] : memref<128x256xf32, #tpu.memory_space<vmem>>, vector<128x256xf32>
    tpu.vector_store %arg6[%c0_11, %c0_12], %20 {strides = array<i32>} : memref<128x256xf32, #tpu.memory_space<vmem>>, vector<128x256xf32>,
    %c1_i32 = arith.constant 1 : i32
    %22 = arith.cmpi eq, %arg1, %c1_i32 : i32
    %23 = arith.extui %22 : i1 to i32
    %c0_i32_13 = arith.constant 0 : i32
    %24 = arith.cmpi ne, %23, %c0_i32_13 : i32
    scf.if %24 {
      %c0_14 = arith.constant 0 : index
      %c0_15 = arith.constant 0 : index
      %25 = vector.load %arg6[%c0_14, %c0_15] : memref<128x256xf32, #tpu.memory_space<vmem>>, vector<128x256xf32>
      %26 = arith.truncf %25 : vector<128x256xf32> to vector<128x256xbf16>
      %c0_16 = arith.constant 0 : index
      %c0_17 = arith.constant 0 : index
      %27 = vector.load %arg5[%c0_16, %c0_17] : memref<128x256xbf16, #tpu.memory_space<vmem>>, vector<128x256xbf16>
      tpu.vector_store %arg5[%c0_16, %c0_17], %26 {strides = array<i32>} : memref<128x256xbf16, #tpu.memory_space<vmem>>, vector<128x256xbf16>,
    } else {
    }
    return
  }
  func.func @transform_0(%arg0: i32, %arg1: i32) -> (i32, i32) {
    %c0_i32 = arith.constant 0 : i32
    %c0_i32_0 = arith.constant 0 : i32
    return %arg0, %c0_i32 : i32, i32
  }
  func.func @transform_1(%arg0: i32, %arg1: i32) -> (i32, i32, i32) {
    %c0_i32 = arith.constant 0 : i32
    %c0_i32_0 = arith.constant 0 : i32
    %c0_i32_1 = arith.constant 0 : i32
    return %arg1, %c0_i32, %c0_i32_0 : i32, i32, i32
  }
  func.func @transform_2(%arg0: i32, %arg1: i32) -> (i32, i32) {
    %c0_i32 = arith.constant 0 : i32
    %c0_i32_0 = arith.constant 0 : i32
    return %arg1, %c0_i32 : i32, i32
  }
  func.func @transform_3(%arg0: i32, %arg1: i32) -> (i32, i32) {
    %c0_i32 = arith.constant 0 : i32
    %c0_i32_0 = arith.constant 0 : i32
    return %arg0, %c0_i32 : i32, i32
  }
}

</mosaic_0001>

<bundles_post_ra>
// kernel: qwen3_mlp_forward.1
= control target key start
LH: loop header
LB: loop body
LE: loop exit
PB: predicated region body
PF: predicated region fallthrough
CT: control target
= control target key end

     0   :  { %s5206_s0 = inlined_call_operand.vmem [shape: bf16[256,256], index: 0, kind: input, shape index: {}]   ;;  %s5207_s1 = inlined_call_operand.hbm [shape: bf16[2,256,512], index: 1, kind: input, shape index: {}]   ;;  %s5208_s2 = inlined_call_operand.hbm [shape: bf16[512,256], index: 2, kind: input, shape index: {}]   ;;  %s5209_s3 = inlined_call_operand.vmem [shape: bf16[256,256], index: 3, kind: output, shape index: {}]  }
   0x1   :  { %5223 = sst [smem:[#allocation38_spill]] %s5207_s1 }
   0x2   :  { %8 = vsyncpa [#allocation4], 0 }
   0x3   :  { %10 = vsyncpa [#allocation4 + $0x1], 0 }
   0x4   :  { %11 = vsyncpa [#allocation6], 0 }
   0x5   :  { %13 = vsyncpa [#allocation6 + $0x1], 0  ;;  %s3528_s12 = smov 0   ;;  %s3530_s13 = smov 0  }
   0x6   :  { %s3532_s14 = smov 0   ;;  %s3534_s15 = smov 0  }
   0x7   :  { %s3536_s16 = smov 0   ;;  %s3538_s17 = smov 0  }
   0x8   :  { %s3540_s18 = smov 0   ;;  %s3542_s19 = smov 0  }
   0x9 LB: > { %s2541_s20 = sadd.s32 4294967295, %s3501_s19   ;;  %s28_s21 = sadd.s32 1, %s3493_s17  ;;  %s3501_s19 = sphi %s3542_s19, %s19_s19   ;;  %s3497_s18 = sphi %s3540_s18, %s5387_s18   ;;  %s3493_s17 = sphi %s3538_s17, %s5386_s17   ;;  %s3489_s16 = sphi %s3536_s16, %s5385_s16   ;;  %s3485_s15 = sphi %s3534_s15, %s5384_s15   ;;  %s3481_s14 = sphi %s3532_s14, %s5383_s14   ;;  %s3477_s13 = sphi %s3530_s13, %s5382_s13   ;;  %s3473_s12 = sphi %s3528_s12, %s5381_s12  }
   0xa   : > { %p29_p0 = scmp.ge.s32.totalorder %s28_s21, 2  ;;  %s31_s22 = sadd.s32 1, %s3497_s18 }
   0xb   : > { %s64_s23 = sadd.s32 1, %s3481_s14  ;;  %p71_p1 = scmp.ne.s32.totalorder %s3481_s14, %s3477_s13 }
   0xc   : > { %s5389_s21 = smov (%p29_p0, %s28_s21), 0  ;;  %s5391_s22 = smov (!%p29_p0, %s31_s22), %s3497_s18 }
   0xd   : > { %s61_s24 = ssub.s32 %s3493_s17, %s5389_s21  ;;  %p72_p2 = scmp.eq.s32.totalorder %s3501_s19, 0 }
   0xe   : > { %p33_p3 = scmp.ge.s32.totalorder %s5391_s22, 2  ;;  %p62_p4 = scmp.eq.s32.totalorder %s61_s24, 0 }
   0xf   : > { %p3578_p5 = por %p72_p2, %p71_p1  ;;  %p77_p6 = scmp.ne.s32.totalorder %s3477_s13, %s3473_s12 }
  0x10   : > { %s5393_s22 = smov (%p33_p3, %s5391_s22), 0  ;;  %p78_p7 = scmp.eq.s32.totalorder %s2541_s20, 0 }
  0x11   : > { %5225 = sst [smem:[#allocation9_spill]] %s5393_s22  ;;  %p3173_p8 = scmp.lt.s32.totalorder %s3501_s19, 4 }
  0x12   : > { %s3586_s26 = scalar_select %p62_p4, %s3481_s14, %s64_s23  }
  0x13   : > { %s3590_s27 = sand.u32 1, %s3481_s14   ;;  %p3592_p9 = por %p78_p7, %p77_p6 }
  0x14   : > { %s2545_s29 = sshll.u32 %s3590_s27, 9  ;;  %s3045_s30 = sshll.u32 %s3493_s17, 9 }
  0x15   : > { %s5227_s1 = sld [smem:[#allocation38_spill]]  ;;  %s167_s8 = scalar_lea.vmem [#allocation3], %s2545_s29 }
  0x16   : > { %s175_s9 = sshll.u32 %s167_s8, 4  ;;  %p3603_p10 = pnand %p3173_p8, %p3578_p5  ;;  %s176_s9 = int_to_ptr.vmem [resolvable:$true] %s175_s9 }
  0x17   : > { %p2552_p11 = scmp.ge.s32.totalorder %s3501_s19, 1  ;;  %p206_p12 = scmp.lt.s32.totalorder %s3501_s19, 5 }
  0x18   : > { %s164_s11 = scalar_lea.sflag [#allocation4], %s3590_s27  ;;  %s3503_s12 = smov 256  }
  0x19   : > { %s3504_s20 = smov 16   ;;  %p207_p13 = pnand %p2552_p11, %p206_p12 }
  0x1a   : > { %s2548_s23 = sshll.u32 %s3590_s27, 8  ;;  %s3047_s24 = sshll.u32 %s3493_s17, 8 }
  0x1b   : > { %s172_s6 = scalar_lea.hbm %s5227_s1, %s3045_s30  ;;  %s195_s25 = scalar_lea.hbm %s5208_s2, %s3047_s24 }
  0x1c   : > { %s173_s7 = sshll.u32 %s172_s6, 4  ;;  %s196_s4 = sshll.u32 %s195_s25, 4  ;;  %s174_s7 = int_to_ptr.hbm [resolvable:$true] %s173_s7  ;;  %s197_s4 = int_to_ptr.hbm [resolvable:$true] %s196_s4 }
  0x1d   : > { %3169 = dma.hbm_to_vmem [thread:$0]  (!%p3603_p10), %s174_s7, 8192, %s176_s9, %s164_s11, %s3503_s12, %s3503_s12, %s3504_s20  }
  0x1e   : > { %s189_s5 = scalar_lea.vmem [#allocation5], %s2548_s23  ;;  %s186_s8 = scalar_lea.sflag [#allocation6], %s3590_s27 }
  0x1f   : > { %s198_s6 = sshll.u32 %s189_s5, 4  ;;  %s3505_s1 = smov 128   ;;  %s199_s6 = int_to_ptr.vmem [resolvable:$true] %s198_s6 }
  0x20   : > { %s3506_s22 = smov 8   ;;  %210 = sbr.rel (%p207_p13) target bundleno = 683 (0x2ab), region = 32 }
  0x21   : > { %3172 = dma.hbm_to_vmem [thread:$0]  (!%p3603_p10), %s197_s4, 4096, %s199_s6, %s186_s8, %s3505_s1, %s3505_s1, %s3506_s22  }
  0x25   : > { %s212_s7 = sand.u32 1, %s3477_s13  }
  0x26   : > { %s2553_s9 = sshll.u32 %s212_s7, 9  ;;  %s213_s11 = scalar_lea.sflag [#allocation4], %s212_s7 }
  0x27   : > { %s3621_s12 = scalar_lea.vmem [#allocation3], %s2553_s9 }
  0x28   : > { %3464 = dma.done.wait (%p3592_p9), %s213_s11, 8192  }
  0x29   : > { %3466 = vsyncadd (%p3592_p9), %s213_s11, 4294959104  ;;  %s2554_s20 = sshll.u32 %s212_s7, 8  ;;  %s223_s27 = scalar_lea.sflag [#allocation6], %s212_s7 }
  0x2a   : > { %s3627_s23 = scalar_lea.vmem [#allocation5], %s2554_s20 }
  0x2b   : > { %3468 = dma.done.wait (%p3592_p9), %s223_s27, 4096  }
  0x2c   : > { %3470 = vsyncadd (%p3592_p9), %s223_s27, 4294963200  ;;  %s2555_s1 = sshll.u32 %s3489_s16, 4  ;;  %p2561_p1 = scmp.ne.s32.totalorder %s3485_s15, 0 }
  0x2d   : > { %p263_p0 = scmp.lt.s32.totalorder %s2555_s1, 31 }
  0x2e   : > { %280 = sbr.rel (%p2561_p1) target bundleno = 84 (0x54), region = 44 }
  0x2f   : > { %s5395_s1 = smov (!%p263_p0, %s2555_s1), 31 }
  0x30   : > { %s3048_s22 = sshll.u32 %s5395_s1, 3 }
  0x31   : > { %s3637_s29 = scalar_lea.vmem %s5206_s0, %s3048_s22  ;;  %s3642_s4 = scalar_lea.vmem %s5209_s3, %s3048_s22 }
  0x33   : > { %v3507_v0 = vmov 0.0  }
  0x34   : > { %281 = vst [vmem:[#allocation2 + $0xb0] sm:$0xff] %v3507_v0 }
  0x35   : > { %282 = vst [vmem:[#allocation2] sm:$0xff] %v3507_v0 }
  0x36   : > { %283 = vst [vmem:[#allocation2 + $0xd8] sm:$0xff] %v3507_v0 }
  0x37   : > { %284 = vst [vmem:[#allocation2 + $0x18] sm:$0xff] %v3507_v0 }
  0x38   : > { %285 = vst [vmem:[#allocation2 + $0x50] sm:$0xff] %v3507_v0 }
  0x39   : > { %286 = vst [vmem:[#allocation2 + $0x68] sm:$0xff] %v3507_v0 }
  0x3a   : > { %287 = vst [vmem:[#allocation2 + $0x30] sm:$0xff] %v3507_v0 }
  0x3b   : > { %288 = vst [vmem:[#allocation2 + $0x48] sm:$0xff] %v3507_v0 }
  0x3c   : > { %289 = vst [vmem:[#allocation2 + $0x80] sm:$0xff] %v3507_v0 }
  0x3d   : > { %290 = vst [vmem:[#allocation2 + $0x88] sm:$0xff] %v3507_v0 }
  0x3e   : > { %291 = vst [vmem:[#allocation2 + $0xe8] sm:$0xff] %v3507_v0 }
  0x3f   : > { %292 = vst [vmem:[#allocation2 + $0xb8] sm:$0xff] %v3507_v0 }
  0x40   : > { %293 = vst [vmem:[#allocation2 + $0x60] sm:$0xff] %v3507_v0 }
  0x41   : > { %294 = vst [vmem:[#allocation2 + $0xf0] sm:$0xff] %v3507_v0 }
  0x42   : > { %295 = vst [vmem:[#allocation2 + $0x8] sm:$0xff] %v3507_v0 }
  0x43   : > { %296 = vst [vmem:[#allocation2 + $0x78] sm:$0xff] %v3507_v0 }
  0x44   : > { %297 = vst [vmem:[#allocation2 + $0x38] sm:$0xff] %v3507_v0 }
  0x45   : > { %298 = vst [vmem:[#allocation2 + $0x58] sm:$0xff] %v3507_v0 }
  0x46   : > { %299 = vst [vmem:[#allocation2 + $0x40] sm:$0xff] %v3507_v0 }
  0x47   : > { %300 = vst [vmem:[#allocation2 + $0xc8] sm:$0xff] %v3507_v0 }
  0x48   : > { %301 = vst [vmem:[#allocation2 + $0xe0] sm:$0xff] %v3507_v0 }
  0x49   : > { %302 = vst [vmem:[#allocation2 + $0x90] sm:$0xff] %v3507_v0 }
  0x4a   : > { %303 = vst [vmem:[#allocation2 + $0x70] sm:$0xff] %v3507_v0 }
  0x4b   : > { %304 = vst [vmem:[#allocation2 + $0xc0] sm:$0xff] %v3507_v0 }
  0x4c   : > { %305 = vst [vmem:[#allocation2 + $0xa8] sm:$0xff] %v3507_v0 }
  0x4d   : > { %306 = vst [vmem:[#allocation2 + $0xd0] sm:$0xff] %v3507_v0 }
  0x4e   : > { %307 = vst [vmem:[#allocation2 + $0x10] sm:$0xff] %v3507_v0 }
  0x4f   : > { %308 = vst [vmem:[#allocation2 + $0x28] sm:$0xff] %v3507_v0 }
  0x50   : > { %309 = vst [vmem:[#allocation2 + $0xa0] sm:$0xff] %v3507_v0 }
  0x51   : > { %310 = vst [vmem:[#allocation2 + $0xf8] sm:$0xff] %v3507_v0 }
  0x52   : > { %311 = vst [vmem:[#allocation2 + $0x20] sm:$0xff] %v3507_v0 }
  0x53   : > { %312 = vst [vmem:[#allocation2 + $0x98] sm:$0xff] %v3507_v0 }
  0x54 PF: > { %v2740_v1 = vld [vmem:[%s3621_s12 + $0xe0] sm:$0xf]  ;;  %v3096_v2 = vld [vmem:[%s3621_s12 + $0xec] sm:$0xf0]  ;;  %v3094_v6 = vld [vmem:[%s3621_s12 + $0xe4] sm:$0xf] }
  0x55   : > { %v2868_v3 = vld [vmem:[%s3621_s12 + $0x1e0] sm:$0xf]  ;;  %v2741_v4 = vor.u32 %v3096_v2, %v2740_v1  ;;  %v3128_v5 = vld [vmem:[%s3621_s12 + $0x1ec] sm:$0xf0]  ;;  %v2742_v7 = vld [vmem:[%s3621_s12 + $0xf0] sm:$0xf0] }
  0x56   : > { %v2869_v8 = vor.u32 %v3128_v5, %v2868_v3  ;;  %v2745_v9 = vor.u32 %v3094_v6, %v2742_v7  ;;  %v3126_v10 = vld [vmem:[%s3621_s12 + $0x1e4] sm:$0xf]  ;;  %v2870_v11 = vld [vmem:[%s3621_s12 + $0x1f0] sm:$0xf0]  ;;  %v2724_v12 = vld [vmem:[%s3621_s12 + $0xc0] sm:$0xf] }
  0x57   : > { %793 = vmatpush.bf16.msra.mxu0 %v2741_v4  ;;  %v2873_v13 = vor.u32 %v3126_v10, %v2870_v11  ;;  %v3092_v14 = vld [vmem:[%s3621_s12 + $0xcc] sm:$0xf0]  ;;  %v2852_v15 = vld [vmem:[%s3621_s12 + $0x1c0] sm:$0xf]  ;;  %v3090_v19 = vld [vmem:[%s3621_s12 + $0xc4] sm:$0xf] }
  0x58   : > { %v3124_v16 = vld [vmem:[%s3621_s12 + $0x1cc] sm:$0xf0]  ;;  %842 = vmatpush.bf16.msra.mxu1 %v2869_v8  ;;  %891 = vmatpush.bf16.msra.mxu2 %v2745_v9  ;;  %v2725_v17 = vor.u32 %v3092_v14, %v2724_v12  ;;  %v2726_v20 = vld [vmem:[%s3621_s12 + $0xd0] sm:$0xf0]  ;;  %v3122_v21 = vld [vmem:[%s3621_s12 + $0x1c4] sm:$0xf] }
  0x59   : > { %v2853_v18 = vor.u32 %v3124_v16, %v2852_v15  ;;  %940 = vmatpush.bf16.msra.mxu3 %v2873_v13  ;;  %v2729_v22 = vor.u32 %v3090_v19, %v2726_v20  ;;  %v2854_v23 = vld [vmem:[%s3621_s12 + $0x1d0] sm:$0xf0]  ;;  %v2708_v24 = vld [vmem:[%s3621_s12 + $0xa0] sm:$0xf]  ;;  %v3088_v25 = vld [vmem:[%s3621_s12 + $0xac] sm:$0xf0] }
  0x5a   : > { %v2857_v26 = vor.u32 %v3122_v21, %v2854_v23  ;;  %v2836_v27 = vld [vmem:[%s3621_s12 + $0x1a0] sm:$0xf]  ;;  %v3120_v28 = vld [vmem:[%s3621_s12 + $0x1ac] sm:$0xf0]  ;;  %v3086_v29 = vld [vmem:[%s3621_s12 + $0xa4] sm:$0xf]  ;;  %v2709_v30 = vor.u32 %v3088_v25, %v2708_v24 }
  0x5b   : > { %794 = vmatpush.bf16.msra.mxu0 %v2725_v17  ;;  %v2710_v31 = vld [vmem:[%s3621_s12 + $0xb0] sm:$0xf0]  ;;  %v3118_v32 = vld [vmem:[%s3621_s12 + $0x1a4] sm:$0xf]  ;;  %v2837_v34 = vor.u32 %v3120_v28, %v2836_v27  ;;  %v2692_v36 = vld [vmem:[%s3621_s12 + $0x80] sm:$0xf] }
  0x5c   : > { %v2838_v33 = vld [vmem:[%s3621_s12 + $0x1b0] sm:$0xf0]  ;;  %843 = vmatpush.bf16.msra.mxu1 %v2853_v18  ;;  %892 = vmatpush.bf16.msra.mxu2 %v2729_v22  ;;  %v2713_v35 = vor.u32 %v3086_v29, %v2710_v31  ;;  %v3084_v37 = vld [vmem:[%s3621_s12 + $0x8c] sm:$0xf0]  ;;  %v2820_v38 = vld [vmem:[%s3621_s12 + $0x180] sm:$0xf] }
  0x5d   : > { %941 = vmatpush.bf16.msra.mxu3 %v2857_v26  ;;  %v2841_v39 = vor.u32 %v3118_v32, %v2838_v33  ;;  %v3116_v40 = vld [vmem:[%s3621_s12 + $0x18c] sm:$0xf0]  ;;  %v3082_v41 = vld [vmem:[%s3621_s12 + $0x84] sm:$0xf]  ;;  %v2694_v42 = vld [vmem:[%s3621_s12 + $0x90] sm:$0xf0]  ;;  %v2693_v45 = vor.u32 %v3084_v37, %v2692_v36 }
  0x5e   : > { %v3114_v43 = vld [vmem:[%s3621_s12 + $0x184] sm:$0xf]  ;;  %v2822_v44 = vld [vmem:[%s3621_s12 + $0x190] sm:$0xf0]  ;;  %v2821_v46 = vor.u32 %v3116_v40, %v2820_v38  ;;  %v2697_v47 = vor.u32 %v3082_v41, %v2694_v42  ;;  %v2676_v48 = vld [vmem:[%s3621_s12 + $0x60] sm:$0xf] }
  0x5f   : > { %795 = vmatpush.bf16.msra.mxu0 %v2709_v30  ;;  %v3080_v49 = vld [vmem:[%s3621_s12 + $0x6c] sm:$0xf0]  ;;  %v2804_v50 = vld [vmem:[%s3621_s12 + $0x160] sm:$0xf]  ;;  %v2825_v51 = vor.u32 %v3114_v43, %v2822_v44  ;;  %v3078_v53 = vld [vmem:[%s3621_s12 + $0x64] sm:$0xf] }
  0x60   : > { %844 = vmatpush.bf16.msra.mxu1 %v2837_v34  ;;  %893 = vmatpush.bf16.msra.mxu2 %v2713_v35  ;;  %v3112_v52 = vld [vmem:[%s3621_s12 + $0x16c] sm:$0xf0]  ;;  %v2678_v54 = vld [vmem:[%s3621_s12 + $0x70] sm:$0xf0]  ;;  %v3110_v55 = vld [vmem:[%s3621_s12 + $0x164] sm:$0xf]  ;;  %v2677_v57 = vor.u32 %v3080_v49, %v2676_v48 }
  0x61   : > { %942 = vmatpush.bf16.msra.mxu3 %v2841_v39  ;;  %v2806_v56 = vld [vmem:[%s3621_s12 + $0x170] sm:$0xf0]  ;;  %v2805_v58 = vor.u32 %v3112_v52, %v2804_v50  ;;  %v2681_v59 = vor.u32 %v3078_v53, %v2678_v54  ;;  %v2660_v60 = vld [vmem:[%s3621_s12 + $0x40] sm:$0xf]  ;;  %v3076_v61 = vld [vmem:[%s3621_s12 + $0x4c] sm:$0xf0] }
  0x62   : > { %v2788_v62 = vld [vmem:[%s3621_s12 + $0x140] sm:$0xf]  ;;  %v2809_v63 = vor.u32 %v3110_v55, %v2806_v56  ;;  %v3108_v0 = vld [vmem:[%s3621_s12 + $0x14c] sm:$0xf0]  ;;  %v3074_v1 = vld [vmem:[%s3621_s12 + $0x44] sm:$0xf]  ;;  %v2661_v5 = vor.u32 %v3076_v61, %v2660_v60 }
  0x63   : > { %796 = vmatpush.bf16.msra.mxu0 %v2693_v45  ;;  %v2662_v2 = vld [vmem:[%s3621_s12 + $0x50] sm:$0xf0]  ;;  %v3106_v3 = vld [vmem:[%s3621_s12 + $0x144] sm:$0xf]  ;;  %v2789_v6 = vor.u32 %v3108_v0, %v2788_v62  ;;  %v2644_v8 = vld [vmem:[%s3621_s12 + $0x20] sm:$0xf] }
  0x64   : > { %845 = vmatpush.bf16.msra.mxu1 %v2821_v46  ;;  %894 = vmatpush.bf16.msra.mxu2 %v2697_v47  ;;  %v2790_v4 = vld [vmem:[%s3621_s12 + $0x150] sm:$0xf0]  ;;  %v2665_v7 = vor.u32 %v3074_v1, %v2662_v2  ;;  %v3072_v9 = vld [vmem:[%s3621_s12 + $0x2c] sm:$0xf0]  ;;  %v2772_v10 = vld [vmem:[%s3621_s12 + $0x120] sm:$0xf] }
  0x65   : > { %943 = vmatpush.bf16.msra.mxu3 %v2825_v51  ;;  %v2793_v11 = vor.u32 %v3106_v3, %v2790_v4  ;;  %v3104_v12 = vld [vmem:[%s3621_s12 + $0x12c] sm:$0xf0]  ;;  %v3070_v13 = vld [vmem:[%s3621_s12 + $0x24] sm:$0xf]  ;;  %v2646_v14 = vld [vmem:[%s3621_s12 + $0x30] sm:$0xf0]  ;;  %v2645_v17 = vor.u32 %v3072_v9, %v2644_v8 }
  0x66   : > { %v3102_v15 = vld [vmem:[%s3621_s12 + $0x124] sm:$0xf]  ;;  %v2774_v16 = vld [vmem:[%s3621_s12 + $0x130] sm:$0xf0]  ;;  %v2628_v18 = vld [vmem:[%s3621_s12] sm:$0xf]  ;;  %v2773_v20 = vor.u32 %v3104_v12, %v2772_v10  ;;  %v2649_v21 = vor.u32 %v3070_v13, %v2646_v14 }
  0x67   : > { %797 = vmatpush.bf16.msra.mxu0 %v2677_v57  ;;  %v3068_v19 = vld [vmem:[%s3621_s12 + $0xc] sm:$0xf0]  ;;  %v2756_v22 = vld [vmem:[%s3621_s12 + $0x100] sm:$0xf]  ;;  %v3066_v24 = vld [vmem:[%s3621_s12 + $0x4] sm:$0xf]  ;;  %v2777_v25 = vor.u32 %v3102_v15, %v2774_v16 }
  0x68   : > { %846 = vmatpush.bf16.msra.mxu1 %v2805_v58  ;;  %895 = vmatpush.bf16.msra.mxu2 %v2681_v59  ;;  %v3100_v23 = vld [vmem:[%s3621_s12 + $0x10c] sm:$0xf0]  ;;  %v2630_v26 = vld [vmem:[%s3621_s12 + $0x10] sm:$0xf0]  ;;  %v3098_v27 = vld [vmem:[%s3621_s12 + $0x104] sm:$0xf]  ;;  %v2629_v32 = vor.u32 %v3068_v19, %v2628_v18 }
  0x69   : > { %944 = vmatpush.bf16.msra.mxu3 %v2809_v63  ;;  %v2758_v28 = vld [vmem:[%s3621_s12 + $0x110] sm:$0xf0]  ;;  %v2564_v29 = vld [vmem:[%s3637_s29] sm:$0xf]  ;;  %v3095_v30 = vld [vmem:[%s3621_s12 + $0xec] sm:$0xf]  ;;  %v2757_v36 = vor.u32 %v3100_v23, %v2756_v22  ;;  %v2633_v37 = vor.u32 %v3066_v24, %v2630_v26 }
  0x6a   : > { %v2750_v31 = vld [vmem:[%s3621_s12 + $0xf8] sm:$0xf0]  ;;  %v3051_v33 = vld [vmem:[%s3637_s29 + $0x4] sm:$0xf0]  ;;  %v3127_v34 = vld [vmem:[%s3621_s12 + $0x1ec] sm:$0xf]  ;;  %v2761_v40 = vor.u32 %v3098_v27, %v2758_v28 }
  0x6b   : > { %798 = vmatpush.bf16.msra.mxu0 %v2661_v5  ;;  %v2878_v35 = vld [vmem:[%s3621_s12 + $0x1f8] sm:$0xf0]  ;;  %v3050_v38 = vld [vmem:[%s3637_s29 + $0x4] sm:$0xf]  ;;  %v2566_v39 = vld [vmem:[%s3637_s29 + $0x8] sm:$0xf0]  ;;  %v2753_v41 = vor.u32 %v3095_v30, %v2750_v31  ;;  %v3720_v45 = vor.u32 %v3051_v33, %v2564_v29 }
  0x6c   : > { %847 = vmatpush.bf16.msra.mxu1 %v2789_v6  ;;  %896 = vmatpush.bf16.msra.mxu2 %v2665_v7  ;;  %v2748_v42 = vld [vmem:[%s3621_s12 + $0xe8] sm:$0xf]  ;;  %v3097_v43 = vld [vmem:[%s3621_s12 + $0xf4] sm:$0xf0]  ;;  %v2881_v46 = vor.u32 %v3127_v34, %v2878_v35  ;;  %v3091_v48 = vld [vmem:[%s3621_s12 + $0xcc] sm:$0xf]  ;;  %v3725_v50 = vor.u32 %v3050_v38, %v2566_v39 }
  0x6d   : > { %945 = vmatpush.bf16.msra.mxu3 %v2793_v11  ;;  %v2876_v44 = vld [vmem:[%s3621_s12 + $0x1e8] sm:$0xf]  ;;  %v3129_v47 = vld [vmem:[%s3621_s12 + $0x1f4] sm:$0xf0]  ;;  %v2734_v49 = vld [vmem:[%s3621_s12 + $0xd8] sm:$0xf0]  ;;  %v2749_v53 = vor.u32 %v3097_v43, %v2748_v42 }
  0x6e   : > { %v3123_v51 = vld [vmem:[%s3621_s12 + $0x1cc] sm:$0xf]  ;;  %v2862_v52 = vld [vmem:[%s3621_s12 + $0x1d8] sm:$0xf0]  ;;  %v2877_v54 = vor.u32 %v3129_v47, %v2876_v44  ;;  %v2737_v55 = vor.u32 %v3091_v48, %v2734_v49  ;;  %v2732_v56 = vld [vmem:[%s3621_s12 + $0xc8] sm:$0xf] }
  0x6f   : > { %799 = vmatpush.bf16.msra.mxu0 %v2645_v17  ;;  %v3093_v57 = vld [vmem:[%s3621_s12 + $0xd4] sm:$0xf0]  ;;  %v2865_v58 = vor.u32 %v3123_v51, %v2862_v52  ;;  %v2860_v59 = vld [vmem:[%s3621_s12 + $0x1c8] sm:$0xf]  ;;  %v3087_v62 = vld [vmem:[%s3621_s12 + $0xac] sm:$0xf] }
  0x70   : > { %848 = vmatpush.bf16.msra.mxu1 %v2773_v20  ;;  %897 = vmatpush.bf16.msra.mxu2 %v2649_v21  ;;  %v3125_v60 = vld [vmem:[%s3621_s12 + $0x1d4] sm:$0xf0]  ;;  %v2733_v61 = vor.u32 %v3093_v57, %v2732_v56  ;;  %v2718_v63 = vld [vmem:[%s3621_s12 + $0xb8] sm:$0xf0]  ;;  %v3119_v0 = vld [vmem:[%s3621_s12 + $0x1ac] sm:$0xf] }
  0x71   : > { %946 = vmatpush.bf16.msra.mxu3 %v2777_v25  ;;  %v2861_v1 = vor.u32 %v3125_v60, %v2860_v59  ;;  %v2721_v2 = vor.u32 %v3087_v62, %v2718_v63  ;;  %v2846_v3 = vld [vmem:[%s3621_s12 + $0x1b8] sm:$0xf0]  ;;  %v2716_v4 = vld [vmem:[%s3621_s12 + $0xa8] sm:$0xf]  ;;  %v3089_v5 = vld [vmem:[%s3621_s12 + $0xb4] sm:$0xf0] }
  0x72   : > { %v2849_v6 = vor.u32 %v3119_v0, %v2846_v3  ;;  %v2844_v7 = vld [vmem:[%s3621_s12 + $0x1a8] sm:$0xf]  ;;  %v3121_v8 = vld [vmem:[%s3621_s12 + $0x1b4] sm:$0xf0]  ;;  %v2717_v9 = vor.u32 %v3089_v5, %v2716_v4  ;;  %v2572_v11 = vld [vmem:[%s3637_s29 + $0x10] sm:$0xf] }
  0x73   : > { %800 = vmatpush.bf16.msra.mxu0 %v2629_v32  ;;  %v2845_v10 = vor.u32 %v3121_v8, %v2844_v7  ;;  %v3053_v12 = vld [vmem:[%s3637_s29 + $0x14] sm:$0xf0]  ;;  %v3052_v13 = vld [vmem:[%s3637_s29 + $0x14] sm:$0xf]  ;;  %v2574_v14 = vld [vmem:[%s3637_s29 + $0x18] sm:$0xf0] }
  0x74   : > { %849 = vmatpush.bf16.msra.mxu1 %v2757_v36  ;;  %898 = vmatpush.bf16.msra.mxu2 %v2633_v37  ;;  %v3749_v15 = vor.u32 %v3053_v12, %v2572_v11  ;;  %v3751_v16 = vor.u32 %v3052_v13, %v2574_v14  ;;  %v3083_v17 = vld [vmem:[%s3621_s12 + $0x8c] sm:$0xf]  ;;  %v2702_v18 = vld [vmem:[%s3621_s12 + $0x98] sm:$0xf0]  ;;  %v2700_v22 = vld [vmem:[%s3621_s12 + $0x88] sm:$0xf] }
  0x75   : > { %947 = vmatpush.bf16.msra.mxu3 %v2761_v40  ;;  %v3115_v19 = vld [vmem:[%s3621_s12 + $0x18c] sm:$0xf]  ;;  %v2705_v20 = vor.u32 %v3083_v17, %v2702_v18  ;;  %v2830_v21 = vld [vmem:[%s3621_s12 + $0x198] sm:$0xf0]  ;;  %v3085_v23 = vld [vmem:[%s3621_s12 + $0x94] sm:$0xf0] }
  0x76   : > { %801 = vmatmul.bf16.vlgmr.msra.gmra.mxu0 %v3720_v45  ;;  %v2833_v24 = vor.u32 %v3115_v19, %v2830_v21  ;;  %v2701_v25 = vor.u32 %v3085_v23, %v2700_v22  ;;  %v2828_v26 = vld [vmem:[%s3621_s12 + $0x188] sm:$0xf]  ;;  %v3117_v27 = vld [vmem:[%s3621_s12 + $0x194] sm:$0xf0]  ;;  %v2580_v29 = vld [vmem:[%s3637_s29 + $0x20] sm:$0xf] }
  0x77   : > { %850 = vmatmul.bf16.vlgmr.msra.gmra.mxu1 %v3725_v50  ;;  %899 = vmatmul.bf16.vlgmr.msra.gmra.mxu2 %v3720_v45  ;;  %v2829_v28 = vor.u32 %v3117_v27, %v2828_v26  ;;  %v3055_v30 = vld [vmem:[%s3637_s29 + $0x24] sm:$0xf0]  ;;  %v3054_v31 = vld [vmem:[%s3637_s29 + $0x24] sm:$0xf]  ;;  %v2582_v32 = vld [vmem:[%s3637_s29 + $0x28] sm:$0xf0] }
  0x78   : > { %1087 = vmatpush.bf16.msrb.mxu2 %v2753_v41  ;;  %948 = vmatmul.bf16.vlgmr.msra.gmra.mxu3 %v3725_v50  ;;  %v3769_v33 = vor.u32 %v3055_v30, %v2580_v29  ;;  %v3771_v34 = vor.u32 %v3054_v31, %v2582_v32  ;;  %v3079_v35 = vld [vmem:[%s3621_s12 + $0x6c] sm:$0xf]  ;;  %v2686_v36 = vld [vmem:[%s3621_s12 + $0x78] sm:$0xf0]  ;;  %v2684_v40 = vld [vmem:[%s3621_s12 + $0x68] sm:$0xf] }
  0x79   : > { %1136 = vmatpush.bf16.msrb.mxu3 %v2881_v46  ;;  %989 = vmatpush.bf16.msrb.mxu0 %v2749_v53  ;;  %v3111_v37 = vld [vmem:[%s3621_s12 + $0x16c] sm:$0xf]  ;;  %v2689_v38 = vor.u32 %v3079_v35, %v2686_v36  ;;  %v2814_v39 = vld [vmem:[%s3621_s12 + $0x178] sm:$0xf0]  ;;  %v3081_v41 = vld [vmem:[%s3621_s12 + $0x74] sm:$0xf0] }
  0x7a   : > { %1038 = vmatpush.bf16.msrb.mxu1 %v2877_v54  ;;  %v2817_v42 = vor.u32 %v3111_v37, %v2814_v39  ;;  %v2685_v43 = vor.u32 %v3081_v41, %v2684_v40  ;;  %v2812_v44 = vld [vmem:[%s3621_s12 + $0x168] sm:$0xf]  ;;  %v3113_v46 = vld [vmem:[%s3621_s12 + $0x174] sm:$0xf0]  ;;  %v2588_v48 = vld [vmem:[%s3637_s29 + $0x30] sm:$0xf] }
  0x7b   : > { %v2813_v47 = vor.u32 %v3113_v46, %v2812_v44  ;;  %v3057_v49 = vld [vmem:[%s3637_s29 + $0x34] sm:$0xf0]  ;;  %v3056_v51 = vld [vmem:[%s3637_s29 + $0x34] sm:$0xf]  ;;  %v2590_v52 = vld [vmem:[%s3637_s29 + $0x38] sm:$0xf0] }
  0x7c   : > { %1088 = vmatpush.bf16.msrb.mxu2 %v2737_v55  ;;  %v3789_v53 = vor.u32 %v3057_v49, %v2588_v48  ;;  %v3791_v54 = vor.u32 %v3056_v51, %v2590_v52  ;;  %v3075_v55 = vld [vmem:[%s3621_s12 + $0x4c] sm:$0xf]  ;;  %v2670_v56 = vld [vmem:[%s3621_s12 + $0x58] sm:$0xf0]  ;;  %v2668_v60 = vld [vmem:[%s3621_s12 + $0x48] sm:$0xf] }
  0x7d   : > { %1137 = vmatpush.bf16.msrb.mxu3 %v2865_v58  ;;  %990 = vmatpush.bf16.msrb.mxu0 %v2733_v61  ;;  %v3107_v57 = vld [vmem:[%s3621_s12 + $0x14c] sm:$0xf]  ;;  %v2673_v58 = vor.u32 %v3075_v55, %v2670_v56  ;;  %v2798_v59 = vld [vmem:[%s3621_s12 + $0x158] sm:$0xf0]  ;;  %v3077_v61 = vld [vmem:[%s3621_s12 + $0x54] sm:$0xf0] }
  0x7e   : > { %1039 = vmatpush.bf16.msrb.mxu1 %v2861_v1  ;;  %v2801_v62 = vor.u32 %v3107_v57, %v2798_v59  ;;  %v2669_v63 = vor.u32 %v3077_v61, %v2668_v60  ;;  %v2796_v0 = vld [vmem:[%s3621_s12 + $0x148] sm:$0xf]  ;;  %v3109_v1 = vld [vmem:[%s3621_s12 + $0x154] sm:$0xf0]  ;;  %v2596_v3 = vld [vmem:[%s3637_s29 + $0x40] sm:$0xf] }
  0x7f   : > { %v3059_v4 = vld [vmem:[%s3637_s29 + $0x44] sm:$0xf0]  ;;  %v3058_v5 = vld [vmem:[%s3637_s29 + $0x44] sm:$0xf]  ;;  %v3103_v11 = vld [vmem:[%s3621_s12 + $0x12c] sm:$0xf] }
  0x80   : > { %1089 = vmatpush.bf16.msrb.mxu2 %v2721_v2  ;;  %v2797_v2 = vor.u32 %v3109_v1, %v2796_v0  ;;  %v3809_v7 = vor.u32 %v3059_v4, %v2596_v3  ;;  %v2782_v13 = vld [vmem:[%s3621_s12 + $0x138] sm:$0xf0]  ;;  %v2652_v14 = vld [vmem:[%s3621_s12 + $0x28] sm:$0xf]  ;;  %v3073_v17 = vld [vmem:[%s3621_s12 + $0x34] sm:$0xf0] }
  0x81   : > { %1138 = vmatpush.bf16.msrb.mxu3 %v2849_v6  ;;  %991 = vmatpush.bf16.msrb.mxu0 %v2717_v9  ;;  %v2598_v6 = vld [vmem:[%s3637_s29 + $0x48] sm:$0xf0]  ;;  %v2785_v18 = vor.u32 %v3103_v11, %v2782_v13  ;;  %v2653_v19 = vor.u32 %v3073_v17, %v2652_v14  ;;  %v3105_v21 = vld [vmem:[%s3621_s12 + $0x134] sm:$0xf0]  ;;  %v2604_v23 = vld [vmem:[%s3637_s29 + $0x50] sm:$0xf] }
  0x82   : > { %1040 = vmatpush.bf16.msrb.mxu1 %v2845_v10  ;;  %v3811_v8 = vor.u32 %v3058_v5, %v2598_v6  ;;  %v3071_v9 = vld [vmem:[%s3621_s12 + $0x2c] sm:$0xf]  ;;  %v2654_v10 = vld [vmem:[%s3621_s12 + $0x38] sm:$0xf0]  ;;  %v2636_v36 = vld [vmem:[%s3621_s12 + $0x8] sm:$0xf] }
  0x83   : > { %v2657_v12 = vor.u32 %v3071_v9, %v2654_v10  ;;  %v2606_v26 = vld [vmem:[%s3637_s29 + $0x58] sm:$0xf0]  ;;  %v3067_v29 = vld [vmem:[%s3621_s12 + $0xc] sm:$0xf]  ;;  %v3069_v37 = vld [vmem:[%s3621_s12 + $0x14] sm:$0xf0] }
  0x84   : > { %1090 = vmatpush.bf16.msrb.mxu2 %v2705_v20  ;;  %v2780_v20 = vld [vmem:[%s3621_s12 + $0x128] sm:$0xf]  ;;  %v2638_v30 = vld [vmem:[%s3621_s12 + $0x18] sm:$0xf0]  ;;  %v3099_v31 = vld [vmem:[%s3621_s12 + $0x10c] sm:$0xf]  ;;  %v2637_v39 = vor.u32 %v3069_v37, %v2636_v36 }
  0x85   : > { %1139 = vmatpush.bf16.msrb.mxu3 %v2833_v24  ;;  %992 = vmatpush.bf16.msrb.mxu0 %v2701_v25  ;;  %v2781_v22 = vor.u32 %v3105_v21, %v2780_v20  ;;  %v3061_v24 = vld [vmem:[%s3637_s29 + $0x54] sm:$0xf0]  ;;  %v3060_v25 = vld [vmem:[%s3637_s29 + $0x54] sm:$0xf]  ;;  %v2641_v32 = vor.u32 %v3067_v29, %v2638_v30  ;;  %v2766_v35 = vld [vmem:[%s3621_s12 + $0x118] sm:$0xf0] }
  0x86   : > { %806 = vmatmul.bf16.gmra.mxu0 %v3749_v15  ;;  %1041 = vmatpush.bf16.msrb.mxu1 %v2829_v28  ;;  %v3829_v27 = vor.u32 %v3061_v24, %v2604_v23  ;;  %v3831_v28 = vor.u32 %v3060_v25, %v2606_v26  ;;  %v2764_v40 = vld [vmem:[%s3621_s12 + $0x108] sm:$0xf]  ;;  %v3101_v41 = vld [vmem:[%s3621_s12 + $0x114] sm:$0xf0]  ;;  %v3062_v46 = vld [vmem:[%s3637_s29 + $0x64] sm:$0xf] }
  0x87   : > { %855 = vmatmul.bf16.gmra.mxu1 %v3751_v16  ;;  %904 = vmatmul.bf16.gmra.mxu2 %v3749_v15  ;;  %v3063_v44 = vld [vmem:[%s3637_s29 + $0x64] sm:$0xf0]  ;;  %v2620_v51 = vld [vmem:[%s3637_s29 + $0x70] sm:$0xf]  ;;  %v3065_v52 = vld [vmem:[%s3637_s29 + $0x74] sm:$0xf0] }
  0x88   : > { %953 = vmatmul.bf16.gmra.mxu3 %v3751_v16  ;;  %1091 = vmatpush.bf16.msrb.mxu2 %v2689_v38  ;;  %v2769_v38 = vor.u32 %v3099_v31, %v2766_v35  ;;  %v3064_v55 = vld [vmem:[%s3637_s29 + $0x74] sm:$0xf]  ;;  %v2622_v56 = vld [vmem:[%s3637_s29 + $0x78] sm:$0xf0]  ;;  %v3861_v57 = vor.u32 %v3065_v52, %v2620_v51  ;;  %v2972_v24 = vld [vmem:[%s3627_s23 + $0x70] sm:$0xf] }
  0x89   : > { %1140 = vmatpush.bf16.msrb.mxu3 %v2817_v42  ;;  %993 = vmatpush.bf16.msrb.mxu0 %v2685_v43  ;;  %v2765_v42 = vor.u32 %v3101_v41, %v2764_v40  ;;  %v2612_v43 = vld [vmem:[%s3637_s29 + $0x60] sm:$0xf]  ;;  %v2974_v11 = vld [vmem:[%s3627_s23 + $0x78] sm:$0xf0]  ;;  %v3160_v13 = vld [vmem:[%s3627_s23 + $0xf4] sm:$0xf] }
  0x8a   : > { %1042 = vmatpush.bf16.msrb.mxu1 %v2813_v47  ;;  %v2614_v47 = vld [vmem:[%s3637_s29 + $0x68] sm:$0xf0]  ;;  %v3849_v48 = vor.u32 %v3063_v44, %v2612_v43  ;;  %v3038_v14 = vld [vmem:[%s3627_s23 + $0xf8] sm:$0xf0]  ;;  %v3161_v26 = vld [vmem:[%s3627_s23 + $0xf4] sm:$0xf0] }
  0x8b   : > { %v3851_v49 = vor.u32 %v3062_v46, %v2614_v47  ;;  %v3041_v20 = vor.u32 %v3160_v13, %v3038_v14  ;;  %v3142_v41 = vld [vmem:[%s3627_s23 + $0x64] sm:$0xf]  ;;  %v3030_v46 = vld [vmem:[%s3627_s23 + $0xe8] sm:$0xf0]  ;;  %v2958_v14 = vld [vmem:[%s3627_s23 + $0x58] sm:$0xf0] }
  0x8c   : > { %1092 = vmatpush.bf16.msrb.mxu2 %v2673_v58  ;;  %v3863_v58 = vor.u32 %v3064_v55, %v2622_v56  ;;  %v3158_v44 = vld [vmem:[%s3627_s23 + $0xe4] sm:$0xf]  ;;  %p3042_p2 = scmp.ne.s32.totalorder %s3485_s15, 1 }
  0x8d   : > { %1141 = vmatpush.bf16.msrb.mxu3 %v2801_v62  ;;  %994 = vmatpush.bf16.msrb.mxu0 %v2669_v63  ;;  %v3033_v51 = vor.u32 %v3158_v44, %v3030_v46 }
  0x8e   : > { %1043 = vmatpush.bf16.msrb.mxu1 %v2797_v2 }
  0x90   : > { %1093 = vmatpush.bf16.msrb.mxu2 %v2657_v12 }
  0x91   : > { %1142 = vmatpush.bf16.msrb.mxu3 %v2785_v18  ;;  %995 = vmatpush.bf16.msrb.mxu0 %v2653_v19 }
  0x92   : > { %1044 = vmatpush.bf16.msrb.mxu1 %v2781_v22 }
  0x94   : > { %1094 = vmatpush.bf16.msrb.mxu2 %v2641_v32 }
  0x95   : > { %1143 = vmatpush.bf16.msrb.mxu3 %v2769_v38  ;;  %996 = vmatpush.bf16.msrb.mxu0 %v2637_v39 }
  0x96   : > { %811 = vmatmul.bf16.gmra.mxu0 %v3769_v33  ;;  %1045 = vmatpush.bf16.msrb.mxu1 %v2765_v42  ;;  %v2966_v42 = vld [vmem:[%s3627_s23 + $0x68] sm:$0xf0] }
  0x97   : > { %860 = vmatmul.bf16.gmra.mxu1 %v3771_v34  ;;  %909 = vmatmul.bf16.gmra.mxu2 %v3769_v33  ;;  %v2969_v47 = vor.u32 %v3142_v41, %v2966_v42 }
  0x98   : > { %958 = vmatmul.bf16.gmra.mxu3 %v3771_v34 }
  0x99   : > { %2244 = vmatpush.bf16.msra.mxu3 %v3041_v20  ;;  %v3022_v20 = vld [vmem:[%s3627_s23 + $0xd8] sm:$0xf0] }
  0x9d   : > { %2245 = vmatpush.bf16.msra.mxu3 %v3033_v51  ;;  %v2950_v51 = vld [vmem:[%s3627_s23 + $0x48] sm:$0xf0] }
  0xa6   : > { %816 = vmatmul.bf16.gmra.mxu0 %v3789_v53 }
  0xa7   : > { %865 = vmatmul.bf16.gmra.mxu1 %v3791_v54  ;;  %914 = vmatmul.bf16.gmra.mxu2 %v3789_v53 }
  0xa8   : > { %963 = vmatmul.bf16.gmra.mxu3 %v3791_v54 }
  0xb6   : > { %821 = vmatmul.bf16.gmra.mxu0 %v3809_v7 }
  0xb7   : > { %870 = vmatmul.bf16.gmra.mxu1 %v3811_v8  ;;  %919 = vmatmul.bf16.gmra.mxu2 %v3809_v7 }
  0xb8   : > { %968 = vmatmul.bf16.gmra.mxu3 %v3811_v8 }
  0xc6   : > { %826 = vmatmul.bf16.gmra.mxu0 %v3829_v27 }
  0xc7   : > { %875 = vmatmul.bf16.gmra.mxu1 %v3831_v28  ;;  %924 = vmatmul.bf16.gmra.mxu2 %v3829_v27 }
  0xc8   : > { %973 = vmatmul.bf16.gmra.mxu3 %v3831_v28 }
  0xd6   : > { %831 = vmatmul.bf16.gmra.mxu0 %v3849_v48 }
  0xd7   : > { %880 = vmatmul.bf16.gmra.mxu1 %v3851_v49  ;;  %929 = vmatmul.bf16.gmra.mxu2 %v3849_v48 }
  0xd8   : > { %978 = vmatmul.bf16.gmra.mxu3 %v3851_v49 }
  0xe6   : > { %836 = vmatmul.bf16.gmra.mxu0 %v3861_v57 }
  0xe7   : > { %885 = vmatmul.bf16.gmra.mxu1 %v3863_v58  ;;  %934 = vmatmul.bf16.gmra.mxu2 %v3861_v57 }
  0xe8   : > { %983 = vmatmul.bf16.gmra.mxu3 %v3863_v58 }
  0xf3   : > { %v802_v59 = vpop.f32.mrf.mxu0 }
  0xf4   : > { %v851_v60 = vpop.f32.mrf.mxu1 }
  0xf5   : > { %v3869_v61 = vadd.f32 %v851_v60, %v802_v59  ;;  %v2964_v59 = vld [vmem:[%s3627_s23 + $0x60] sm:$0xf]  ;;  %v3143_v60 = vld [vmem:[%s3627_s23 + $0x64] sm:$0xf0] }
  0xf6   : > { %997 = vmatmul.bf16.vlgmr.msrb.gmra.mxu0 %v3720_v45 }
  0xf7   : > { %1046 = vmatmul.bf16.vlgmr.msrb.gmra.mxu1 %v3725_v50  ;;  %1095 = vmatmul.bf16.vlgmr.msrb.gmra.mxu2 %v3720_v45 }
  0xf8   : > { %1144 = vmatmul.bf16.vlgmr.msrb.gmra.mxu3 %v3725_v50  ;;  %v3144_v50 = vld [vmem:[%s3627_s23 + $0x74] sm:$0xf] }
  0xf9   : > { %v2977_v12 = vor.u32 %v3144_v50, %v2974_v11 }
  0xfa   : > { %v900_v62 = vpop.f32.mrf.mxu2 }
  0xfb   : > { %v949_v63 = vpop.f32.mrf.mxu3  ;;  %v804_v0 = vpop.f32.mrf.mxu0  ;;  %2195 = vmatpush.bf16.msra.mxu2 %v2977_v12  ;;  %v3140_v12 = vld [vmem:[%s3627_s23 + $0x54] sm:$0xf] }
  0xfc   : > { %v3875_v1 = vadd.f32 %v949_v63, %v900_v62  ;;  %v853_v2 = vpop.f32.mrf.mxu1  ;;  %v3028_v62 = vld [vmem:[%s3627_s23 + $0xe0] sm:$0xf] }
  0xfd   : > { %v3877_v3 = vadd.f32 %v853_v2, %v804_v0  ;;  %v2965_v0 = vor.u32 %v3143_v60, %v2964_v59  ;;  %v3159_v2 = vld [vmem:[%s3627_s23 + $0xe4] sm:$0xf0] }
  0xfe   : > { %v2883_v59 = vmul.f32 -1.442695, %v3875_v1 }
  0xff   : > { %2196 = vmatpush.bf16.msra.mxu2 %v2969_v47  ;;  %v3138_v47 = vld [vmem:[%s3627_s23 + $0x44] sm:$0xf] }
 0x102   : > { %v902_v4 = vpop.f32.mrf.mxu2 }
 0x103   : > { %v951_v5 = vpop.f32.mrf.mxu3  ;;  %v807_v6 = vpop.f32.mrf.mxu0 }
 0x104   : > { %v3879_v9 = vadd.f32 %v951_v5, %v902_v4  ;;  %v856_v10 = vpop.f32.mrf.mxu1  ;;  %v3029_v4 = vor.u32 %v3159_v2, %v3028_v62  ;;  %v2884_v2 = vmul.f32 -1.442695, %v3877_v3 }
 0x105   : > { %v3881_v45 = vadd.f32 %v856_v10, %v807_v6 }
 0x106   : > { %1002 = vmatmul.bf16.gmra.mxu0 %v3749_v15 }
 0x107   : > { %1051 = vmatmul.bf16.gmra.mxu1 %v3751_v16  ;;  %1100 = vmatmul.bf16.gmra.mxu2 %v3749_v15  ;;  %v3145_v15 = vld [vmem:[%s3627_s23 + $0x74] sm:$0xf0] }
 0x108   : > { %1149 = vmatmul.bf16.gmra.mxu3 %v3751_v16  ;;  %v2973_v25 = vor.u32 %v3145_v15, %v2972_v24  ;;  %v3036_v16 = vld [vmem:[%s3627_s23 + $0xf0] sm:$0xf] }
 0x109   : > { %v3037_v32 = vor.u32 %v3161_v26, %v3036_v16 }
 0x10a   : > { %v905_v17 = vpop.f32.mrf.mxu2  ;;  %2097 = vmatpush.bf16.msra.mxu0 %v2973_v25 }
 0x10b   : > { %v954_v18 = vpop.f32.mrf.mxu3  ;;  %v809_v19 = vpop.f32.mrf.mxu0  ;;  %2146 = vmatpush.bf16.msra.mxu1 %v3037_v32 }
 0x10c   : > { %v3891_v21 = vadd.f32 %v954_v18, %v905_v17  ;;  %v858_v22 = vpop.f32.mrf.mxu1 }
 0x10d   : > { %v3893_v23 = vadd.f32 %v858_v22, %v809_v19  ;;  %v3156_v19 = vld [vmem:[%s3627_s23 + $0xd4] sm:$0xf]  ;;  %v2961_v22 = vor.u32 %v3140_v12, %v2958_v14 }
 0x10e   : > { %2098 = vmatpush.bf16.msra.mxu0 %v2965_v0  ;;  %v3139_v0 = vld [vmem:[%s3627_s23 + $0x44] sm:$0xf0] }
 0x10f   : > { %2147 = vmatpush.bf16.msra.mxu1 %v3029_v4  ;;  %2197 = vmatpush.bf16.msra.mxu2 %v2961_v22  ;;  %v3012_v4 = vld [vmem:[%s3627_s23 + $0xc0] sm:$0xf] }
 0x112   : > { %v907_v29 = vpop.f32.mrf.mxu2 }
 0x113   : > { %v956_v30 = vpop.f32.mrf.mxu3  ;;  %v812_v31 = vpop.f32.mrf.mxu0 }
 0x114   : > { %v861_v35 = vpop.f32.mrf.mxu1  ;;  %v3899_v36 = vadd.f32 %v956_v30, %v907_v29  ;;  %v2956_v29 = vld [vmem:[%s3627_s23 + $0x50] sm:$0xf]  ;;  %v3141_v30 = vld [vmem:[%s3627_s23 + $0x54] sm:$0xf0] }
 0x115   : > { %v3902_v37 = vadd.f32 %v861_v35, %v812_v31 }
 0x116   : > { %1007 = vmatmul.bf16.gmra.mxu0 %v3769_v33 }
 0x117   : > { %1056 = vmatmul.bf16.gmra.mxu1 %v3771_v34  ;;  %1105 = vmatmul.bf16.gmra.mxu2 %v3769_v33 }
 0x118   : > { %1154 = vmatmul.bf16.gmra.mxu3 %v3771_v34 }
 0x11a   : > { %v910_v38 = vpop.f32.mrf.mxu2 }
 0x11b   : > { %v959_v39 = vpop.f32.mrf.mxu3  ;;  %v814_v40 = vpop.f32.mrf.mxu0 }
 0x11c   : > { %v863_v43 = vpop.f32.mrf.mxu1  ;;  %v3911_v52 = vadd.f32 %v959_v39, %v910_v38  ;;  %v2957_v38 = vor.u32 %v3141_v30, %v2956_v29  ;;  %v3020_v39 = vld [vmem:[%s3627_s23 + $0xd0] sm:$0xf]  ;;  %v3006_v30 = vld [vmem:[%s3627_s23 + $0xb8] sm:$0xf0] }
 0x11d   : > { %v3913_v34 = vadd.f32 %v863_v43, %v814_v40  ;;  %v3157_v40 = vld [vmem:[%s3627_s23 + $0xd4] sm:$0xf0] }
 0x11e   : > { %5229 = vst [vmem:[#allocation10_spill] sm:$0xff] %v3911_v52  ;;  %2099 = vmatpush.bf16.msra.mxu0 %v2957_v38  ;;  %v3021_v41 = vor.u32 %v3157_v40, %v3020_v39  ;;  %v2886_v40 = vmul.f32 -1.442695, %v3881_v45 }
 0x120   : > { %2148 = vmatpush.bf16.msra.mxu1 %v3021_v41 }
 0x122   : > { %v912_v33 = vpop.f32.mrf.mxu2 }
 0x123   : > { %v961_v55 = vpop.f32.mrf.mxu3  ;;  %v817_v56 = vpop.f32.mrf.mxu0 }
 0x124   : > { %v866_v63 = vpop.f32.mrf.mxu1  ;;  %v3920_v5 = vadd.f32 %v961_v55, %v912_v33  ;;  %v3154_v33 = vld [vmem:[%s3627_s23 + $0xc4] sm:$0xf]  ;;  %v3014_v55 = vld [vmem:[%s3627_s23 + $0xc8] sm:$0xf0] }
 0x125   : > { %v3922_v6 = vadd.f32 %v866_v63, %v817_v56  ;;  %v2953_v56 = vor.u32 %v3138_v47, %v2950_v51  ;;  %v3017_v60 = vor.u32 %v3154_v33, %v3014_v55  ;;  %v2948_v63 = vld [vmem:[%s3627_s23 + $0x40] sm:$0xf]  ;;  %v2888_v51 = vmul.f32 -1.442695, %v3893_v23 }
 0x126   : > { %1012 = vmatmul.bf16.gmra.mxu0 %v3789_v53  ;;  %5230 = vst [vmem:[#allocation11_spill] sm:$0xff] %v3920_v5  ;;  %v2949_v12 = vor.u32 %v3139_v0, %v2948_v63 }
 0x127   : > { %5231 = vst [vmem:[#allocation12_spill] sm:$0xff] %v3922_v6  ;;  %1061 = vmatmul.bf16.gmra.mxu1 %v3791_v54  ;;  %1110 = vmatmul.bf16.gmra.mxu2 %v3789_v53  ;;  %v3025_v53 = vor.u32 %v3156_v19, %v3022_v20 }
 0x128   : > { %1159 = vmatmul.bf16.gmra.mxu3 %v3791_v54  ;;  %2198 = vmatpush.bf16.msra.mxu2 %v2953_v56 }
 0x129   : > { %2246 = vmatpush.bf16.msra.mxu3 %v3025_v53  ;;  %2100 = vmatpush.bf16.msra.mxu0 %v2949_v12  ;;  %v3136_v53 = vld [vmem:[%s3627_s23 + $0x34] sm:$0xf] }
 0x12a   : > { %v915_v10 = vpop.f32.mrf.mxu2 }
 0x12b   : > { %v964_v50 = vpop.f32.mrf.mxu3  ;;  %v819_v11 = vpop.f32.mrf.mxu0 }
 0x12c   : > { %v868_v13 = vpop.f32.mrf.mxu1  ;;  %v3929_v17 = vadd.f32 %v964_v50, %v915_v10  ;;  %v3155_v10 = vld [vmem:[%s3627_s23 + $0xc4] sm:$0xf0] }
 0x12d   : > { %v3931_v18 = vadd.f32 %v868_v13, %v819_v11  ;;  %2247 = vmatpush.bf16.msra.mxu3 %v3017_v60  ;;  %v3013_v14 = vor.u32 %v3155_v10, %v3012_v4 }
 0x12e   : > { %5232 = vst [vmem:[#allocation13_spill] sm:$0xff] %v3929_v17 }
 0x12f   : > { %5233 = vst [vmem:[#allocation14_spill] sm:$0xff] %v3931_v18  ;;  %2149 = vmatpush.bf16.msra.mxu1 %v3013_v14 }
 0x132   : > { %v917_v24 = vpop.f32.mrf.mxu2 }
 0x133   : > { %v966_v54 = vpop.f32.mrf.mxu3  ;;  %v822_v15 = vpop.f32.mrf.mxu0 }
 0x134   : > { %v871_v25 = vpop.f32.mrf.mxu1  ;;  %v3935_v16 = vadd.f32 %v966_v54, %v917_v24  ;;  %v2942_v24 = vld [vmem:[%s3627_s23 + $0x38] sm:$0xf0]  ;;  %v3152_v54 = vld [vmem:[%s3627_s23 + $0xb4] sm:$0xf] }
 0x135   : > { %v3954_v46 = vadd.f32 %v871_v25, %v822_v15  ;;  %v2945_v29 = vor.u32 %v3136_v53, %v2942_v24  ;;  %v2940_v24 = vld [vmem:[%s3627_s23 + $0x30] sm:$0xf] }
 0x136   : > { %5234 = vst [vmem:[#allocation15_spill] sm:$0xff] %v3935_v16  ;;  %1017 = vmatmul.bf16.gmra.mxu0 %v3809_v7 }
 0x137   : > { %1066 = vmatmul.bf16.gmra.mxu1 %v3811_v8  ;;  %1115 = vmatmul.bf16.gmra.mxu2 %v3809_v7  ;;  %v2882_v7 = vmul.f32 -1.442695, %v3869_v61 }
 0x138   : > { %1164 = vmatmul.bf16.gmra.mxu3 %v3811_v8  ;;  %2199 = vmatpush.bf16.msra.mxu2 %v2945_v29  ;;  %v3004_v29 = vld [vmem:[%s3627_s23 + $0xb0] sm:$0xf] }
 0x139   : > { %3243 = vpow2.f32 %v2882_v7  ;;  %v2887_v7 = vmul.f32 -1.442695, %v3891_v21 }
 0x13a   : > { %v920_v26 = vpop.f32.mrf.mxu2  ;;  %3245 = vpow2.f32 %v2883_v59 }
 0x13b   : > { %v969_v31 = vpop.f32.mrf.mxu3  ;;  %v3943_v32 = vpop.f32.mrf.mxu0  ;;  %3247 = vpow2.f32 %v2884_v2  ;;  %v2889_v2 = vmul.f32 -1.442695, %v3899_v36 }
 0x13c   : > { %v3945_v35 = vpop.f32.mrf.mxu1  ;;  %v3965_v62 = vadd.f32 %v969_v31, %v920_v26  ;;  %v2885_v26 = vmul.f32 -1.442695, %v3879_v9 }
 0x13e   : > { %5237 = vst [vmem:[#allocation18_spill] sm:$0xff] %v3965_v62  ;;  %v3151_v62 = vld [vmem:[%s3627_s23 + $0xa4] sm:$0xf0] }
 0x142   : > { %v3950_v8 = vpop.f32.mrf.mxu2 }
 0x143   : > { %5235 = vst [vmem:[#allocation16_spill] sm:$0xff] %v3950_v8  ;;  %v3952_v42 = vpop.f32.mrf.mxu3  ;;  %v827_v43 = vpop.f32.mrf.mxu0  ;;  %v2996_v8 = vld [vmem:[%s3627_s23 + $0xa0] sm:$0xf] }
 0x144   : > { %5236 = vst [vmem:[#allocation17_spill] sm:$0xff] %v3952_v42  ;;  %v876_v44 = vpop.f32.mrf.mxu1  ;;  %v2893_v42 = vmul.f32 -1.442695, %v3920_v5 }
 0x145   : > { %v3976_v19 = vadd.f32 %v876_v44, %v827_v43  ;;  %v3009_v43 = vor.u32 %v3152_v54, %v3006_v30  ;;  %v3153_v30 = vld [vmem:[%s3627_s23 + $0xb4] sm:$0xf0] }
 0x146   : > { %1022 = vmatmul.bf16.gmra.mxu0 %v3829_v27 }
 0x147   : > { %1071 = vmatmul.bf16.gmra.mxu1 %v3831_v28  ;;  %1120 = vmatmul.bf16.gmra.mxu2 %v3829_v27  ;;  %5240 = vst [vmem:[#allocation21_spill] sm:$0xff] %v3976_v19  ;;  %v2932_v19 = vld [vmem:[%s3627_s23 + $0x20] sm:$0xf] }
 0x148   : > { %1169 = vmatmul.bf16.gmra.mxu3 %v3831_v28  ;;  %v3244_v28 = vpop.eup %3243 }
 0x149   : > { %v3978_v20 = vadd.f32 1.0, %v3244_v28  ;;  %v3246_v25 = vpop.eup %3245  ;;  %2248 = vmatpush.bf16.msra.mxu3 %v3009_v43 }
 0x14a   : > { %v925_v50 = vpop.f32.mrf.mxu2  ;;  %v3248_v39 = vpop.eup %3247  ;;  %v3998_v44 = vadd.f32 1.0, %v3246_v25 }
 0x14b   : > { %v974_v27 = vpop.f32.mrf.mxu3  ;;  %v3972_v11 = vpop.f32.mrf.mxu0  ;;  %3249 = vrcp.f32 %v3978_v20  ;;  %v4001_v47 = vadd.f32 1.0, %v3248_v39  ;;  %v1322_v12 = vand.u32 2147483647, %v3978_v20  ;;  %vm1318_vm0 = vweird.f32 %v3978_v20 }
 0x14c   : > { %5238 = vst [vmem:[#allocation19_spill] sm:$0xff] %v3972_v11  ;;  %v3974_v13 = vpop.f32.mrf.mxu1  ;;  %v3980_v22 = vadd.f32 %v974_v27, %v925_v50  ;;  %3251 = vpow2.f32 %v2885_v26  ;;  %v3137_v26 = vld [vmem:[%s3627_s23 + $0x34] sm:$0xf0]  ;;  %vm1333_vm4 = vweird.f32 %v3998_v44 }
 0x14d   : > { %5239 = vst [vmem:[#allocation20_spill] sm:$0xff] %v3974_v13  ;;  %3253 = vpow2.f32 %v2886_v40  ;;  %vm4059_vm2 = vcmp.eq.f32.partialorder %v1322_v12, 8.507059e+37  ;;  %v1337_v12 = vand.u32 2147483647, %v3998_v44  ;;  %vm1348_vm5 = vweird.f32 %v4001_v47 }
 0x14e   : > { %5241 = vst [vmem:[#allocation22_spill] sm:$0xff] %v3980_v22  ;;  %3255 = vpow2.f32 %v2887_v7 }
 0x14f   : > { %3257 = vrcp.f32 %v3998_v44  ;;  %vm4120_vm8 = vcmp.eq.f32.partialorder %v1337_v12, 8.507059e+37 }
 0x150   : > { %3259 = vrcp.f32 %v4001_v47 }
 0x151   : > { %v4007_v33 = vpop.eup %3249  ;;  %3261 = vpow2.f32 %v2888_v51  ;;  %v2890_v51 = vmul.f32 -1.442695, %v3902_v37 }
 0x152   : > { %v3985_v15 = vpop.f32.mrf.mxu2  ;;  %v1314_v60 = vmul.f32 %v4007_v33, %v3978_v20  ;;  %3263 = vpow2.f32 %v2889_v2  ;;  %v3005_v2 = vor.u32 %v3153_v30, %v3004_v29  ;;  %vm1319_vm1 = vweird.f32 %v4007_v33 }
 0x153   : > { %5242 = vst [vmem:[#allocation23_spill] sm:$0xff] %v3985_v15  ;;  %v3990_v31 = vpop.f32.mrf.mxu3  ;;  %v3992_v38 = vpop.f32.mrf.mxu0  ;;  %vm4079_vm3 = vmor %vm1318_vm0, %vm1319_vm1 }
 0x154   : > { %5243 = vst [vmem:[#allocation24_spill] sm:$0xff] %v3990_v31  ;;  %v3995_v41 = vpop.f32.mrf.mxu1  ;;  %v1315_v10 = vsub.f32 1.0, %v1314_v60  ;;  %2150 = vmatpush.bf16.msra.mxu1 %v3005_v2 }
 0x156   : > { %1027 = vmatmul.bf16.gmra.mxu0 %v3849_v48  ;;  %v1316_v7 = vmul.f32 %v4007_v33, %v1315_v10 }
 0x157   : > { %1076 = vmatmul.bf16.gmra.mxu1 %v3851_v49  ;;  %1125 = vmatmul.bf16.gmra.mxu2 %v3849_v48 }
 0x158   : > { %1174 = vmatmul.bf16.gmra.mxu3 %v3851_v49  ;;  %v3252_v49 = vpop.eup %3251 }
 0x159   : > { %v3254_v63 = vpop.eup %3253  ;;  %v4024_v50 = vadd.f32 1.0, %v3252_v49 }
 0x15a   : > { %v4010_v55 = vpop.f32.mrf.mxu2  ;;  %v3256_v0 = vpop.eup %3255  ;;  %v4029_v14 = vadd.f32 1.0, %v3254_v63  ;;  %v1324_v63 = vand.u32 2147483648, %v3978_v20  ;;  %v2934_v20 = vld [vmem:[%s3627_s23 + $0x28] sm:$0xf0] }
 0x15b   : > { %v4013_v56 = vpop.f32.mrf.mxu3  ;;  %v4015_v59 = vpop.f32.mrf.mxu0  ;;  %v4031_v53 = vadd.f32 1.0, %v3256_v0  ;;  %3265 = vrcp.f32 %v4024_v50  ;;  %v2941_v0 = vor.u32 %v3137_v26, %v2940_v24  ;;  %v1352_v26 = vand.u32 2147483647, %v4001_v47 }
 0x15c   : > { %5244 = vst [vmem:[#allocation25_spill] sm:$0xff] %v4015_v59  ;;  %v4019_v48 = vpop.f32.mrf.mxu1  ;;  %v4022_v4 = vpop.eup %3257  ;;  %3267 = vrcp.f32 %v4029_v14  ;;  %v3150_v59 = vld [vmem:[%s3627_s23 + $0xa4] sm:$0xf]  ;;  %vm1363_vm12 = vweird.f32 %v4024_v50  ;;  %vm1378_vm13 = vweird.f32 %v4029_v14 }
 0x15d   : > { %5245 = vst [vmem:[#allocation26_spill] sm:$0xff] %v4019_v48  ;;  %v4026_v27 = vpop.eup %3259  ;;  %v1329_v25 = vmul.f32 %v4022_v4, %v3998_v44  ;;  %3269 = vrcp.f32 %v4031_v53  ;;  %2101 = vmatpush.bf16.msra.mxu0 %v2941_v0  ;;  %v3134_v0 = vld [vmem:[%s3627_s23 + $0x24] sm:$0xf]  ;;  %vm1334_vm6 = vweird.f32 %v4022_v4  ;;  %vm4124_vm9 = vcmp.eq.f32.partialorder %v1352_v26, 8.507059e+37 }
 0x15e   : > { %v3262_v28 = vpop.eup %3261  ;;  %v1344_v43 = vmul.f32 %v4026_v27, %v4001_v47  ;;  %3271 = vpow2.f32 %v2890_v51  ;;  %v2891_v51 = vmul.f32 -1.442695, %v3911_v52  ;;  %vm1349_vm7 = vweird.f32 %v4026_v27  ;;  %vm4158_vm10 = vmor %vm1333_vm4, %vm1334_vm6 }
 0x15f   : > { %v4053_v49 = vadd.f32 1.0, %v3262_v28  ;;  %v1317_v28 = vadd.f32 %v4007_v33, %v1316_v7  ;;  %v3264_v24 = vpop.eup %3263  ;;  %v1325_v7 = vor.u32 1.1754944e-38, %v1324_v63  ;;  %v2998_v63 = vld [vmem:[%s3627_s23 + $0xa8] sm:$0xf0]  ;;  %vm4171_vm11 = vmor %vm1348_vm5, %vm1349_vm7 }
 0x160   : > { %v1345_v48 = vsub.f32 1.0, %v1344_v43  ;;  %v1354_v43 = vand.u32 2147483648, %v4001_v47 }
 0x161   : > { %3273 = vrcp.f32 %v4053_v49  ;;  %v4073_v29 = vpop.eup %3265 }
 0x162   : > { %v4034_v54 = vpop.f32.mrf.mxu2  ;;  %v4102_v15 = vpop.eup %3267  ;;  %v1346_v11 = vmul.f32 %v4026_v27, %v1345_v48  ;;  %v1359_v30 = vmul.f32 %v4073_v29, %v4024_v50  ;;  %v1355_v10 = vor.u32 1.1754944e-38, %v1354_v43  ;;  %vm1364_vm14 = vweird.f32 %v4073_v29 }
 0x163   : > { %5246 = vst [vmem:[#allocation27_spill] sm:$0xff] %v4034_v54  ;;  %v4041_v39 = vpop.f32.mrf.mxu3  ;;  %v4043_v40 = vpop.f32.mrf.mxu0  ;;  %v1339_v54 = vand.u32 2147483648, %v3998_v44  ;;  %vm1379_vm0 = vweird.f32 %v4102_v15 }
 0x164   : > { %5247 = vst [vmem:[#allocation28_spill] sm:$0xff] %v4041_v39  ;;  %v4050_v60 = vpop.f32.mrf.mxu1  ;;  %v1330_v39 = vsub.f32 1.0, %v1329_v25  ;;  %v2892_v25 = vmul.f32 -1.442695, %v3913_v34  ;;  %vm4281_vm6 = vmor %vm1378_vm13, %vm1379_vm0 }
 0x165   : > { %v4107_v13 = vor.u32 1.1754944e-38, %v1339_v54 }
 0x166   : > { %1032 = vmatmul.bf16.gmra.mxu0 %v3861_v57  ;;  %3275 = vpow2.f32 %v2892_v25  ;;  %v3135_v25 = vld [vmem:[%s3627_s23 + $0x24] sm:$0xf0] }
 0x167   : > { %1081 = vmatmul.bf16.gmra.mxu1 %v3863_v58  ;;  %1130 = vmatmul.bf16.gmra.mxu2 %v3861_v57  ;;  %v1331_v57 = vmul.f32 %v4022_v4, %v1330_v39  ;;  %v1321_v39 = vsel %vm4079_vm3, %v4007_v33, %v1317_v28  ;;  %v1369_v28 = vand.u32 2147483648, %v4024_v50  ;;  %3277 = vpow2.f32 %v2891_v51  ;;  %vm4257_vm3 = vmor %vm1363_vm12, %vm1364_vm14 }
 0x168   : > { %1179 = vmatmul.bf16.gmra.mxu3 %v3863_v58  ;;  %v4093_v58 = vadd.f32 %v3995_v41, %v3992_v38  ;;  %v4110_v38 = vadd.f32 1.0, %v3264_v24  ;;  %v2937_v24 = vor.u32 %v3134_v0, %v2934_v20  ;;  %v1326_v12 = vsel %vm4059_vm2, %v1325_v7, %v1321_v39 }
 0x169   : > { %v1332_v26 = vadd.f32 %v4022_v4, %v1331_v57  ;;  %v1360_v7 = vsub.f32 1.0, %v1359_v30  ;;  %v2933_v51 = vor.u32 %v3135_v25, %v2932_v19  ;;  %v4152_v57 = vmul.f32 %v1326_v12, %v3869_v61 }
 0x16a   : > { %v4086_v2 = vpop.f32.mrf.mxu2  ;;  %5252 = vst [vmem:[#allocation29_spill] sm:$0xff] %v4093_v58  ;;  %v4114_v58 = vpop.eup %3269  ;;  %3279 = vrcp.f32 %v4110_v38  ;;  %2200 = vmatpush.bf16.msra.mxu2 %v2937_v24  ;;  %v1367_v20 = vand.u32 2147483647, %v4024_v50  ;;  %v4176_v44 = vor.u32 1.1754944e-38, %v1369_v28  ;;  %vm1393_vm2 = vweird.f32 %v4031_v53 }
 0x16b   : > { %v4098_v22 = vpop.f32.mrf.mxu3  ;;  %v4100_v31 = vpop.f32.mrf.mxu0  ;;  %3281 = vpow2.f32 %v2893_v42  ;;  %2102 = vmatpush.bf16.msra.mxu0 %v2933_v51  ;;  %v1336_v47 = vsel %vm4158_vm10, %v4022_v4, %v1332_v26  ;;  %v1361_v51 = vmul.f32 %v4073_v29, %v1360_v7  ;;  %v4199_v4 = vadd.f32 %v4050_v60, %v4043_v40 }
 0x16c   : > { %5253 = vst [vmem:[#allocation30_spill] sm:$0xff] %v4100_v31  ;;  %v4112_v41 = vpop.f32.mrf.mxu1  ;;  %v3272_v33 = vpop.eup %3271  ;;  %v4131_v31 = vadd.f32 %v4013_v56, %v4010_v55  ;;  %v1374_v55 = vmul.f32 %v4102_v15, %v4029_v14  ;;  %v1389_v56 = vmul.f32 %v4114_v58, %v4031_v53  ;;  %v1341_v7 = vsel %vm4120_vm8, %v4107_v13, %v1336_v47 }
 0x16d   : > { %5254 = vst [vmem:[#allocation31_spill] sm:$0xff] %v4112_v41  ;;  %v3001_v41 = vor.u32 %v3150_v59, %v2998_v63  ;;  %v4135_v52 = vpop.eup %3273  ;;  %v1347_v59 = vadd.f32 %v4026_v27, %v1346_v11  ;;  %v4149_v0 = vadd.f32 1.0, %v3272_v33  ;;  %v2997_v63 = vor.u32 %v3151_v62, %v2996_v8  ;;  %v3132_v8 = vld [vmem:[%s3627_s23 + $0x14] sm:$0xf]  ;;  %v2926_v62 = vld [vmem:[%s3627_s23 + $0x18] sm:$0xf0] }
 0x16e   : > { %5259 = vst [vmem:[#allocation32_spill] sm:$0xff] %v4131_v31  ;;  %v1404_v43 = vmul.f32 %v4135_v52, %v4053_v49  ;;  %v3276_v19 = vpop.eup %3275  ;;  %v1375_v24 = vsub.f32 1.0, %v1374_v55  ;;  %v1390_v25 = vsub.f32 1.0, %v1389_v56  ;;  %v3148_v55 = vld [vmem:[%s3627_s23 + $0x94] sm:$0xf]  ;;  %vm4217_vm15 = vcmp.eq.f32.partialorder %v1367_v20, 8.507059e+37 }
 0x16f   : > { %2249 = vmatpush.bf16.msra.mxu3 %v3001_v41  ;;  %v1384_v41 = vand.u32 2147483648, %v4029_v14  ;;  %v1351_v28 = vsel %vm4171_vm11, %v4026_v27, %v1347_v59  ;;  %2151 = vmatpush.bf16.msra.mxu1 %v2997_v63  ;;  %v3278_v12 = vpop.eup %3277  ;;  %3283 = vrcp.f32 %v4149_v0  ;;  %5266 = vst [vmem:[#allocation35_spill] sm:$0xff] %v4199_v4  ;;  %v4203_v27 = vadd.f32 1.0, %v3276_v19  ;;  %v2990_v56 = vld [vmem:[%s3627_s23 + $0x98] sm:$0xf0] }
 0x170   : > { %v4201_v26 = vpop.eup %3279  ;;  %v1405_v11 = vsub.f32 1.0, %v1404_v43  ;;  %v2929_v59 = vor.u32 %v3132_v8, %v2926_v62  ;;  %v4209_v63 = vadd.f32 %v4098_v22, %v4086_v2  ;;  %v1356_v40 = vsel %vm4124_vm9, %v1355_v10, %v1351_v28 }
 0x171   : > { %v1382_v43 = vand.u32 2147483647, %v4029_v14  ;;  %v1376_v19 = vmul.f32 %v4102_v15, %v1375_v24  ;;  %v1391_v22 = vmul.f32 %v4114_v58, %v1390_v25  ;;  %v1397_v2 = vand.u32 2147483647, %v4031_v53  ;;  %v3282_v13 = vpop.eup %3281 }
 0x172   : > { %v4165_v39 = vpop.f32.mrf.mxu2  ;;  %5267 = vst [vmem:[#allocation36_spill] sm:$0xff] %v4209_v63  ;;  %2201 = vmatpush.bf16.msra.mxu2 %v2929_v59  ;;  %v2993_v48 = vor.u32 %v3148_v55, %v2990_v56  ;;  %v1362_v54 = vadd.f32 %v4073_v29, %v1361_v51  ;;  %v1419_v10 = vmul.f32 %v4201_v26, %v4110_v38  ;;  %v4228_v20 = vadd.f32 1.0, %v3278_v12  ;;  %v3149_v63 = vld [vmem:[%s3627_s23 + $0x94] sm:$0xf0] }
 0x173   : > { %5262 = vst [vmem:[#allocation33_spill] sm:$0xff] %v4165_v39  ;;  %v4182_v30 = vpop.f32.mrf.mxu3  ;;  %v4184_v33 = vpop.f32.mrf.mxu0  ;;  %v4231_v61 = vmul.f32 %v1341_v7, %v3875_v1  ;;  %v1385_v8 = vor.u32 1.1754944e-38, %v1384_v41  ;;  %v1406_v62 = vmul.f32 %v4135_v52, %v1405_v11  ;;  %v4240_v24 = vmul.f32 %v1356_v40, %v3877_v3 }
 0x174   : > { %5265 = vst [vmem:[#allocation34_spill] sm:$0xff] %v4182_v30  ;;  %v4192_v42 = vpop.f32.mrf.mxu1  ;;  %v2894_v30 = vmul.f32 -1.442695, %v3922_v6  ;;  %2250 = vmatpush.bf16.msra.mxu3 %v2993_v48  ;;  %vm4243_vm1 = vcmp.eq.f32.partialorder %v1382_v43, 8.507059e+37  ;;  %v1399_v1 = vand.u32 2147483648, %v4031_v53  ;;  %v1377_v12 = vadd.f32 %v4102_v15, %v1376_v19 }
 0x175   : > { %v4237_v28 = vpop.eup %3283  ;;  %v1392_v51 = vadd.f32 %v4114_v58, %v1391_v22  ;;  %vm1394_vm4 = vweird.f32 %v4114_v58  ;;  %vm4264_vm5 = vcmp.eq.f32.partialorder %v1397_v2, 8.507059e+37  ;;  %v4268_v59 = vadd.f32 1.0, %v3282_v13  ;;  %v3147_v6 = vld [vmem:[%s3627_s23 + $0x84] sm:$0xf0] }
 0x176   : > { %3285 = vpow2.f32 %v2894_v30  ;;  %v1366_v50 = vsel %vm4257_vm3, %v4073_v29, %v1362_v54  ;;  %v1420_v56 = vsub.f32 1.0, %v1419_v10  ;;  %v2896_v7 = vmul.f32 -1.442695, %v3931_v18  ;;  %vm4292_vm8 = vmor %vm1393_vm2, %vm1394_vm4  ;;  %v2980_v18 = vld [vmem:[%s3627_s23 + $0x80] sm:$0xf] }
 0x177   : > { %3287 = vrcp.f32 %v4203_v27  ;;  %v1407_v43 = vadd.f32 %v4135_v52, %v1406_v62  ;;  %vm1409_vm7 = vweird.f32 %v4135_v52  ;;  %v1434_v29 = vmul.f32 %v4237_v28, %v4149_v0 }
 0x178   : > { %3289 = vrcp.f32 %v4228_v20  ;;  %v2895_v19 = vmul.f32 -1.442695, %v3929_v17  ;;  %v1400_v14 = vor.u32 1.1754944e-38, %v1399_v1  ;;  %vm1408_vm9 = vweird.f32 %v4053_v49  ;;  %v2924_v1 = vld [vmem:[%s3627_s23 + $0x10] sm:$0xf] }
 0x179   : > { %v1412_v48 = vand.u32 2147483647, %v4053_v49  ;;  %v1414_v13 = vand.u32 2147483648, %v4053_v49  ;;  %v1371_v10 = vsel %vm4217_vm15, %v4176_v44, %v1366_v50  ;;  %v1381_v53 = vsel %vm4281_vm6, %v4102_v15, %v1377_v12  ;;  %vm4311_vm10 = vmor %vm1408_vm9, %vm1409_vm7  ;;  %v3131_v17 = vld [vmem:[%s3627_s23 + $0x4] sm:$0xf0] }
 0x17a   : > { %v4235_v47 = vpop.f32.mrf.mxu2  ;;  %v1396_v62 = vsel %vm4292_vm8, %v4114_v58, %v1392_v51  ;;  %3291 = vrcp.f32 %v4268_v59  ;;  %v1421_v49 = vmul.f32 %v4201_v26, %v1420_v56  ;;  %v1427_v3 = vand.u32 2147483647, %v4110_v38 }
 0x17b   : > { %v4249_v41 = vpop.f32.mrf.mxu3  ;;  %v4251_v25 = vpop.f32.mrf.mxu0  ;;  %v1429_v44 = vand.u32 2147483648, %v4110_v38  ;;  %3293 = vpow2.f32 %v2896_v7  ;;  %v1411_v15 = vsel %vm4311_vm10, %v4135_v52, %v1407_v43  ;;  %v1435_v60 = vsub.f32 1.0, %v1434_v29 }
 0x17c   : > { %v4270_v55 = vpop.f32.mrf.mxu1  ;;  %v3286_v22 = vpop.eup %3285  ;;  %3295 = vpow2.f32 %v2895_v19  ;;  %vm1413_vm11 = vcmp.eq.f32.partialorder %v1412_v48, 8.507059e+37  ;;  %v1415_v50 = vor.u32 1.1754944e-38, %v1414_v13  ;;  %v2897_v40 = vmul.f32 -1.442695, %v3935_v16 }
 0x17d   : > { %v4299_v54 = vpop.eup %3287  ;;  %v4321_v12 = vadd.f32 1.0, %v3286_v22  ;;  %v4335_v52 = vmul.f32 %v1371_v10, %v3879_v9  ;;  %v1386_v43 = vsel %vm4243_vm1, %v1385_v8, %v1381_v53  ;;  %vm1423_vm12 = vweird.f32 %v4110_v38 }
 0x17e   : > { %v4325_v51 = vpop.eup %3289  ;;  %v1464_v56 = vmul.f32 %v4299_v54, %v4203_v27  ;;  %vm1424_vm13 = vweird.f32 %v4201_v26  ;;  %v1401_v19 = vsel %vm4264_vm5, %v1400_v14, %v1396_v62  ;;  %v1416_v22 = vsel %vm1413_vm11, %v1415_v50, %v1411_v15  ;;  %v2988_v50 = vld [vmem:[%s3627_s23 + $0x90] sm:$0xf] }
 0x17f   : > { %v1422_v48 = vadd.f32 %v4201_v26, %v1421_v49  ;;  %vm4346_vm14 = vcmp.eq.f32.partialorder %v1427_v3, 8.507059e+37  ;;  %v1430_v8 = vor.u32 1.1754944e-38, %v1429_v44  ;;  %v1436_v38 = vmul.f32 %v4237_v28, %v1435_v60  ;;  %vm4356_vm15 = vmor %vm1423_vm12, %vm1424_vm13  ;;  %v3133_v60 = vld [vmem:[%s3627_s23 + $0x14] sm:$0xf0] }
 0x180   : > { %v4350_v9 = vpop.eup %3291  ;;  %v1449_v30 = vmul.f32 %v4325_v51, %v4228_v20  ;;  %3297 = vrcp.f32 %v4321_v12  ;;  %v1442_v10 = vand.u32 2147483647, %v4149_v0  ;;  %v1444_v53 = vand.u32 2147483648, %v4149_v0 }
 0x181   : > { %v3294_v11 = vpop.eup %3293  ;;  %v1465_v62 = vsub.f32 1.0, %v1464_v56  ;;  %3299 = vpow2.f32 %v2897_v40  ;;  %v4364_v3 = vmul.f32 %v1386_v43, %v3881_v45  ;;  %v4367_v44 = vmul.f32 %v1401_v19, %v3891_v21 }
 0x182   : > { %v4323_v58 = vpop.f32.mrf.mxu2  ;;  %v3296_v49 = vpop.eup %3295  ;;  %v4370_v15 = vmul.f32 %v1416_v22, %v3893_v23  ;;  %vm1438_vm0 = vweird.f32 %v4149_v0  ;;  %v1426_v56 = vsel %vm4356_vm15, %v4201_v26, %v1422_v48  ;;  %vm1439_vm1 = vweird.f32 %v4237_v28 }
 0x183   : > { %v4330_v7 = vpop.f32.mrf.mxu3  ;;  %v4332_v2 = vpop.f32.mrf.mxu0  ;;  %v1459_v45 = vand.u32 2147483648, %v4228_v20  ;;  %v1472_v40 = vand.u32 2147483647, %v4203_v27  ;;  %v1437_v21 = vadd.f32 %v4237_v28, %v1436_v38  ;;  %v1450_v43 = vsub.f32 1.0, %v1449_v30  ;;  %vm4412_vm4 = vmor %vm1438_vm0, %vm1439_vm1 }
 0x184   : > { %v4341_v29 = vpop.f32.mrf.mxu1  ;;  %v1479_v23 = vmul.f32 %v4350_v9, %v4268_v59  ;;  %v4385_v19 = vadd.f32 1.0, %v3294_v11  ;;  %v1466_v4 = vmul.f32 %v4299_v54, %v1465_v62  ;;  %v4390_v14 = vadd.f32 1.0, %v3296_v49 }
 0x185   : > { %v2925_v26 = vor.u32 %v3133_v60, %v2924_v1  ;;  %v2989_v48 = vor.u32 %v3149_v63, %v2988_v50  ;;  %vm4398_vm2 = vcmp.eq.f32.partialorder %v1442_v10, 8.507059e+37  ;;  %v1445_v30 = vor.u32 1.1754944e-38, %v1444_v53  ;;  %v3130_v50 = vld [vmem:[%s3627_s23 + $0x4] sm:$0xf]  ;;  %v2916_v53 = vld [vmem:[%s3627_s23] sm:$0xf] }
 0x186   : > { %v4396_v16 = vpop.eup %3297  ;;  %vm1453_vm3 = vweird.f32 %v4228_v20  ;;  %v1474_v11 = vand.u32 2147483648, %v4203_v27  ;;  %v1431_v1 = vsel %vm4346_vm14, %v1430_v8, %v1426_v56  ;;  %v4417_v49 = vor.u32 1.1754944e-38, %v1459_v45  ;;  %v2918_v56 = vld [vmem:[%s3627_s23 + $0x8] sm:$0xf0] }
 0x187   : > { %v3300_v63 = vpop.eup %3299  ;;  %vm4419_vm5 = vcmp.eq.f32.partialorder %v1472_v40, 8.507059e+37  ;;  %2103 = vmatpush.bf16.msra.mxu0 %v2925_v26  ;;  %2152 = vmatpush.bf16.msra.mxu1 %v2989_v48  ;;  %v1441_v0 = vsel %vm4412_vm4, %v4237_v28, %v1437_v21  ;;  %v1451_v13 = vmul.f32 %v4325_v51, %v1450_v43  ;;  %v1489_v8 = vand.u32 2147483648, %v4268_v59  ;;  %v3146_v28 = vld [vmem:[%s3627_s23 + $0x84] sm:$0xf]  ;;  %v2982_v21 = vld [vmem:[%s3627_s23 + $0x88] sm:$0xf0] }
 0x188   : > { %5290 = vst [vmem:[#allocation37_spill] sm:$0xff] %v4417_v49  ;;  %3301 = vrcp.f32 %v4385_v19  ;;  %v1467_v45 = vadd.f32 %v4299_v54, %v1466_v4  ;;  %vm1469_vm6 = vweird.f32 %v4299_v54  ;;  %v1480_v40 = vsub.f32 1.0, %v1479_v23 }
 0x189   : > { %3303 = vrcp.f32 %v4390_v14  ;;  %v1475_v26 = vor.u32 1.1754944e-38, %v1474_v11  ;;  %v1487_v43 = vand.u32 2147483647, %v4268_v59  ;;  %v1494_v48 = vmul.f32 %v4396_v16, %v4321_v12 }
 0x18a   : > { %v4387_v22 = vpop.f32.mrf.mxu2  ;;  %v4439_v10 = vadd.f32 1.0, %v3300_v63  ;;  %v4443_v4 = vmul.f32 %v1431_v1, %v3899_v36  ;;  %vm1454_vm7 = vweird.f32 %v4325_v51  ;;  %vm1468_vm8 = vweird.f32 %v4203_v27 }
 0x18b   : > { %v4392_v39 = vpop.f32.mrf.mxu3  ;;  %v4394_v31 = vpop.f32.mrf.mxu0  ;;  %v2921_v23 = vor.u32 %v3130_v50, %v2918_v56  ;;  %v1446_v11 = vsel %vm4398_vm2, %v1445_v30, %v1441_v0  ;;  %v4453_v5 = vadd.f32 %v4325_v51, %v1451_v13  ;;  %vm4457_vm9 = vmor %vm1468_vm8, %vm1469_vm6  ;;  %vm1483_vm10 = vweird.f32 %v4268_v59 }
 0x18c   : > { %v4404_v62 = vpop.f32.mrf.mxu1  ;;  %v4462_v36 = vor.u32 1.1754944e-38, %v1489_v8  ;;  %v2985_v27 = vor.u32 %v3146_v28, %v2982_v21  ;;  %v1471_v38 = vsel %vm4457_vm9, %v4299_v54, %v1467_v45  ;;  %v1481_v30 = vmul.f32 %v4350_v9, %v1480_v40  ;;  %vm4483_vm11 = vmor %vm1453_vm3, %vm1454_vm7 }
 0x18d   : > { %v1048_v0 = vadd.f32 %v4192_v42, %v4184_v33  ;;  %2202 = vmatpush.bf16.msra.mxu2 %v2921_v23  ;;  %v1146_v13 = vadd.f32 %v4249_v41, %v4235_v47  ;;  %v1495_v8 = vsub.f32 1.0, %v1494_v48  ;;  %v1050_v28 = vadd.f32 %v4270_v55, %v4251_v25 }
 0x18e   : > { %v4472_v49 = vpop.eup %3301  ;;  %2251 = vmatpush.bf16.msra.mxu3 %v2985_v27  ;;  %v2917_v21 = vor.u32 %v3131_v17, %v2916_v53  ;;  %v2981_v54 = vor.u32 %v3147_v6, %v2980_v18  ;;  %v1801_v33 = vmul.f32 %v1446_v11, %v3902_v37  ;;  %v1504_v47 = vand.u32 2147483648, %v4321_v12  ;;  %v5306_v27 = vld [vmem:[#allocation17_spill] sm:$0xff] }
 0x18f   : > { %v4476_v40 = vpop.eup %3303  ;;  %3305 = vrcp.f32 %v4439_v10  ;;  %v1148_v6 = vadd.f32 %v4330_v7, %v4323_v58  ;;  %v1456_v37 = vsel %vm4483_vm11, %v4325_v51, %v4453_v5  ;;  %v1476_v17 = vsel %vm4419_vm5, %v1475_v26, %v1471_v38 }
 0x190   : > { %vm1484_vm12 = vweird.f32 %v4350_v9  ;;  %vm1498_vm13 = vweird.f32 %v4321_v12  ;;  %v1827_v18 = vmul.f32 %v4240_v24, %v1050_v28  ;;  %2104 = vmatpush.bf16.msra.mxu0 %v2917_v21  ;;  %2153 = vmatpush.bf16.msra.mxu1 %v2981_v54  ;;  %v1524_v41 = vmul.f32 %v4472_v49, %v4385_v19  ;;  %v5310_v24 = vld [vmem:[#allocation10_spill] sm:$0xff] }
 0x191   : > { %v1825_v25 = vmul.f32 %v4152_v57, %v1048_v0  ;;  %v1826_v55 = vmul.f32 %v4231_v61, %v1146_v13  ;;  %v1828_v5 = vmul.f32 %v4335_v52, %v1148_v6  ;;  %v5297_v58 = vand.u32 2147483647, %v4228_v20  ;;  %vm4538_vm1 = vmor %vm1483_vm10, %vm1484_vm12 }
 0x192   : > { %v1103_v1 = vpop.f32.mrf.mxu2  ;;  %v1482_v7 = vadd.f32 %v4350_v9, %v1481_v30  ;;  %vm4512_vm15 = vcmp.eq.f32.partialorder %v1487_v43, 8.507059e+37  ;;  %v1496_v53 = vmul.f32 %v4396_v16, %v1495_v8  ;;  %vm1499_vm0 = vweird.f32 %v4396_v16 }
 0x193   : > { %v1152_v50 = vpop.f32.mrf.mxu3  ;;  %v1008_v56 = vpop.f32.mrf.mxu0  ;;  %vm4507_vm14 = vcmp.eq.f32.partialorder %v5297_v58, 8.507059e+37  ;;  %v1509_v57 = vmul.f32 %v4476_v40, %v4390_v14  ;;  %v4522_v20 = vadd.f32 %v3945_v35, %v3943_v32  ;;  %v1889_v61 = vpack.c.bf16 %v1827_v18, %v1825_v25  ;;  %v5304_v35 = vld [vmem:[#allocation18_spill] sm:$0xff]  ;;  %vm4573_vm2 = vmor %vm1498_vm13, %vm1499_vm0 }
 0x194   : > { %v1057_v45 = vpop.f32.mrf.mxu1  ;;  %v1890_v52 = vpack.c.bf16 %v1828_v5, %v1826_v55  ;;  %v1053_v60 = vadd.f32 %v4341_v29, %v4332_v2  ;;  %v1803_v26 = vmul.f32 %v1476_v17, %v3913_v34  ;;  %v2898_v43 = vmul.f32 -1.442695, %v3954_v46  ;;  %v5305_v29 = vld [vmem:[#allocation16_spill] sm:$0xff] }
 0x195   : > { %v1151_v48 = vadd.f32 %v4392_v39, %v4387_v22  ;;  %v1055_v23 = vadd.f32 %v4404_v62, %v4394_v31  ;;  %v4532_v63 = vpop.eup %3305  ;;  %v1525_v34 = vsub.f32 1.0, %v1524_v41  ;;  %v2899_v2 = vmul.f32 -1.442695, %v5304_v35  ;;  %2105 = vmatmul.bf16.vlgmr.msra.gmra.mxu0 %v1889_v61  ;;  %2203 = vmatmul.bf16.vlgmr.msra.gmra.mxu2 %v1889_v61 }
 0x196   : > { %v4545_v39 = vadd.f32 %v5306_v27, %v5305_v29  ;;  %v1153_v31 = vadd.f32 %v1152_v50, %v1103_v1  ;;  %v1486_v59 = vsel %vm4538_vm1, %v4350_v9, %v1482_v7  ;;  %v1497_v38 = vadd.f32 %v4396_v16, %v1496_v53  ;;  %2154 = vmatmul.bf16.vlgmr.msra.gmra.mxu1 %v1890_v52 }
 0x197   : > { %v1510_v30 = vsub.f32 1.0, %v1509_v57  ;;  %2252 = vmatmul.bf16.vlgmr.msra.gmra.mxu3 %v1890_v52  ;;  %v1058_v0 = vadd.f32 %v1057_v45, %v1008_v56  ;;  %v2900_v8 = vmul.f32 -1.442695, %v4522_v20  ;;  %v1829_v28 = vmul.f32 %v4364_v3, %v1053_v60  ;;  %v5311_v57 = vld [vmem:[#allocation11_spill] sm:$0xff] }
 0x198   : > { %v1831_v21 = vmul.f32 %v4370_v15, %v1055_v23  ;;  %v1832_v1 = vmul.f32 %v4443_v4, %v1153_v31  ;;  %v1539_v50 = vmul.f32 %v4532_v63, %v4439_v10  ;;  %3307 = vpow2.f32 %v2898_v43  ;;  %v5307_v4 = vld [vmem:[#allocation37_spill] sm:$0xff] }
 0x199   : > { %v1830_v9 = vmul.f32 %v4367_v44, %v1151_v48  ;;  %v1526_v42 = vmul.f32 %v4472_v49, %v1525_v34  ;;  %3309 = vpow2.f32 %v2899_v2  ;;  %v2901_v56 = vmul.f32 -1.442695, %v4545_v39 }
 0x19a   : > { %v1106_v11 = vpop.f32.mrf.mxu2  ;;  %v1891_v45 = vpack.c.bf16 %v1831_v21, %v1829_v28  ;;  %v1502_v6 = vand.u32 2147483647, %v4321_v12  ;;  %v1833_v3 = vmul.f32 %v1801_v33, %v1058_v0  ;;  %v1461_v18 = vsel %vm4507_vm14, %v5307_v4, %v1456_v37  ;;  %v5318_v4 = vld [vmem:[#allocation14_spill] sm:$0xff] }
 0x19b   : > { %v1155_v22 = vpop.f32.mrf.mxu3  ;;  %v1010_v62 = vpop.f32.mrf.mxu0  ;;  %v4561_v17 = vpack.c.bf16 %v1832_v1, %v1830_v9  ;;  %v1491_v44 = vsel %vm4512_vm15, %v4462_v36, %v1486_v59  ;;  %v1505_v33 = vor.u32 1.1754944e-38, %v1504_v47  ;;  %3311 = vpow2.f32 %v2900_v8  ;;  %v5315_v8 = vld [vmem:[#allocation21_spill] sm:$0xff] }
 0x19c   : > { %v1059_v13 = vpop.f32.mrf.mxu1  ;;  %v1501_v37 = vsel %vm4573_vm2, %v4396_v16, %v1497_v38  ;;  %v1540_v25 = vsub.f32 1.0, %v1539_v50  ;;  %v1156_v55 = vadd.f32 %v1155_v22, %v1106_v11  ;;  %v1511_v58 = vmul.f32 %v4476_v40, %v1510_v30  ;;  %v5314_v30 = vld [vmem:[#allocation12_spill] sm:$0xff] }
 0x19d   : > { %v1060_v54 = vadd.f32 %v1059_v13, %v1010_v62  ;;  %v1527_v51 = vadd.f32 %v4472_v49, %v1526_v42  ;;  %vm1529_vm3 = vweird.f32 %v4472_v49  ;;  %3313 = vpow2.f32 %v2901_v56 }
 0x19e   : > { %v3308_v47 = vpop.eup %3307  ;;  %v1802_v53 = vmul.f32 %v1461_v18, %v5310_v24  ;;  %v1804_v61 = vmul.f32 %v1491_v44, %v5311_v57  ;;  %v1534_v16 = vand.u32 2147483648, %v4385_v19  ;;  %vm1503_vm4 = vcmp.eq.f32.partialorder %v1502_v6, 8.507059e+37  ;;  %v5322_v44 = vld [vmem:[#allocation20_spill] sm:$0xff] }
 0x19f   : > { %v1835_v15 = vmul.f32 %v1803_v26, %v1060_v54  ;;  %v3310_v26 = vpop.eup %3309  ;;  %vm1513_vm5 = vweird.f32 %v4390_v14  ;;  %vm1528_vm6 = vweird.f32 %v4385_v19  ;;  %v1532_v43 = vand.u32 2147483647, %v4385_v19 }
 0x1a0   : > { %v1506_v48 = vsel %vm1503_vm4, %v1505_v33, %v1501_v37  ;;  %vm4595_vm7 = vmor %vm1528_vm6, %vm1529_vm3  ;;  %v1541_v11 = vmul.f32 %v4532_v63, %v1540_v25  ;;  %v1834_v32 = vmul.f32 %v1802_v53, %v1156_v55  ;;  %v1512_v29 = vadd.f32 %v4476_v40, %v1511_v58  ;;  %v5323_v25 = vld [vmem:[#allocation23_spill] sm:$0xff]  ;;  %v5324_v55 = vld [vmem:[#allocation24_spill] sm:$0xff] }
 0x1a1   : > { %v4582_v36 = vpack.c.bf16 %v1835_v15, %v1833_v3  ;;  %v3312_v2 = vpop.eup %3311  ;;  %vm1514_vm8 = vweird.f32 %v4476_v40  ;;  %v1531_v19 = vsel %vm4595_vm7, %v4472_v49, %v1527_v51  ;;  %v4605_v27 = vadd.f32 1.0, %v3308_v47  ;;  %v5325_v47 = vld [vmem:[#allocation22_spill] sm:$0xff] }
 0x1a2   : > { %v1108_v5 = vpop.f32.mrf.mxu2  ;;  %v1517_v31 = vand.u32 2147483647, %v4390_v14  ;;  %v1535_v22 = vor.u32 1.1754944e-38, %v1534_v16  ;;  %v4608_v62 = vadd.f32 1.0, %v3310_v26  ;;  %v1805_v0 = vmul.f32 %v1506_v48, %v5314_v30  ;;  %vm4617_vm10 = vmor %vm1513_vm5, %vm1514_vm8 }
 0x1a3   : > { %v1157_v7 = vpop.f32.mrf.mxu3  ;;  %v1013_v12 = vpop.f32.mrf.mxu0  ;;  %v1519_v13 = vand.u32 2147483648, %v4390_v14  ;;  %vm1533_vm9 = vcmp.eq.f32.partialorder %v1532_v43, 8.507059e+37  ;;  %v2902_v28 = vmul.f32 -1.442695, %v5315_v8  ;;  %v1542_v1 = vadd.f32 %v4532_v63, %v1541_v11  ;;  %v5326_v43 = vld [vmem:[#allocation13_spill] sm:$0xff] }
 0x1a4   : > { %v1158_v52 = vadd.f32 %v1157_v7, %v1108_v5  ;;  %v1062_v60 = vpop.f32.mrf.mxu1  ;;  %v3314_v38 = vpop.eup %3313  ;;  %v1536_v21 = vsel %vm1533_vm9, %v1535_v22, %v1531_v19  ;;  %vm1544_vm11 = vweird.f32 %v4532_v63  ;;  %v4623_v50 = vadd.f32 1.0, %v3312_v2 }
 0x1a5   : > { %v1516_v9 = vsel %vm4617_vm10, %v4476_v40, %v1512_v29  ;;  %v1549_v54 = vand.u32 2147483648, %v4439_v10  ;;  %3315 = vrcp.f32 %v4605_v27  ;;  %2110 = vmatmul.bf16.gmra.mxu0 %v1891_v45  ;;  %2208 = vmatmul.bf16.gmra.mxu2 %v1891_v45  ;;  %v1063_v14 = vadd.f32 %v1062_v60, %v1013_v12 }
 0x1a6   : > { %v1836_v34 = vmul.f32 %v1804_v61, %v1158_v52  ;;  %vm1543_vm12 = vweird.f32 %v4439_v10  ;;  %v1547_v6 = vand.u32 2147483647, %v4439_v10  ;;  %3317 = vrcp.f32 %v4608_v62  ;;  %2159 = vmatmul.bf16.gmra.mxu1 %v4561_v17  ;;  %v5321_v10 = vld [vmem:[#allocation19_spill] sm:$0xff] }
 0x1a7   : > { %v4633_v3 = vadd.f32 1.0, %v3314_v38  ;;  %2257 = vmatmul.bf16.gmra.mxu3 %v4561_v17  ;;  %v1807_v18 = vmul.f32 %v1536_v21, %v5318_v4  ;;  %vm4640_vm13 = vmor %vm1543_vm12, %vm1544_vm11  ;;  %3319 = vpow2.f32 %v2902_v28  ;;  %v4646_v41 = vadd.f32 %v5322_v44, %v5321_v10 }
 0x1a8   : > { %v4610_v59 = vpack.c.bf16 %v1836_v34, %v1834_v32  ;;  %v1520_v37 = vor.u32 1.1754944e-38, %v1519_v13  ;;  %v1546_v17 = vsel %vm4640_vm13, %v4532_v63, %v1542_v1  ;;  %3321 = vrcp.f32 %v4623_v50  ;;  %v5327_v34 = vld [vmem:[#allocation15_spill] sm:$0xff] }
 0x1a9   : > { %v4654_v5 = vadd.f32 %v5324_v55, %v5323_v25  ;;  %vm1518_vm14 = vcmp.eq.f32.partialorder %v1517_v31, 8.507059e+37  ;;  %v1550_v58 = vor.u32 1.1754944e-38, %v1549_v54  ;;  %v1837_v51 = vmul.f32 %v1805_v0, %v1063_v14 }
 0x1aa   : > { %v1111_v42 = vpop.f32.mrf.mxu2  ;;  %v1521_v12 = vsel %vm1518_vm14, %v1520_v37, %v1516_v9  ;;  %vm1548_vm15 = vcmp.eq.f32.partialorder %v1547_v6, 8.507059e+37  ;;  %3323 = vrcp.f32 %v4633_v3  ;;  %v2903_v24 = vmul.f32 -1.442695, %v5325_v47  ;;  %v5329_v37 = vld [vmem:[#allocation26_spill] sm:$0xff] }
 0x1ab   : > { %v1160_v56 = vpop.f32.mrf.mxu3  ;;  %v1015_v40 = vpop.f32.mrf.mxu0  ;;  %v1551_v57 = vsel %vm1548_vm15, %v1550_v58, %v1546_v17  ;;  %v2904_v63 = vmul.f32 -1.442695, %v4646_v41  ;;  %v2905_v52 = vmul.f32 -1.442695, %v4654_v5  ;;  %v1806_v48 = vmul.f32 %v1521_v12, %v5326_v43 }
 0x1ac   : > { %v1064_v15 = vpop.f32.mrf.mxu1  ;;  %v4658_v53 = vpop.eup %3315  ;;  %v1161_v60 = vadd.f32 %v1160_v56, %v1111_v42  ;;  %v1808_v2 = vmul.f32 %v1551_v57, %v5327_v34  ;;  %3325 = vpow2.f32 %v2903_v24  ;;  %v1562_v56 = vand.u32 2147483647, %v4605_v27 }
 0x1ad   : > { %v1065_v33 = vadd.f32 %v1064_v15, %v1015_v40  ;;  %v4663_v16 = vpop.eup %3317  ;;  %v1554_v29 = vmul.f32 %v4658_v53, %v4605_v27  ;;  %3327 = vpow2.f32 %v2904_v63  ;;  %vm1558_vm0 = vweird.f32 %v4605_v27 }
 0x1ae   : > { %v3320_v26 = vpop.eup %3319  ;;  %v1569_v31 = vmul.f32 %v4663_v16, %v4608_v62  ;;  %3329 = vpow2.f32 %v2905_v52  ;;  %v1838_v38 = vmul.f32 %v1806_v48, %v1161_v60  ;;  %v1564_v45 = vand.u32 2147483648, %v4605_v27  ;;  %v5334_v60 = vld [vmem:[#allocation29_spill] sm:$0xff] }
 0x1af   : > { %v1839_v7 = vmul.f32 %v1807_v18, %v1065_v33  ;;  %v4667_v32 = vpop.eup %3321  ;;  %v4682_v49 = vadd.f32 1.0, %v3320_v26  ;;  %v1555_v21 = vsub.f32 1.0, %v1554_v29  ;;  %vm1573_vm1 = vweird.f32 %v4608_v62  ;;  %v5328_v33 = vld [vmem:[#allocation25_spill] sm:$0xff] }
 0x1b0   : > { %v4674_v22 = vpop.eup %3323  ;;  %v1584_v28 = vmul.f32 %v4667_v32, %v4623_v50  ;;  %v1570_v9 = vsub.f32 1.0, %v1569_v31  ;;  %v4707_v17 = vadd.f32 %v5329_v37, %v5328_v33  ;;  %v1577_v25 = vand.u32 2147483647, %v4608_v62 }
 0x1b1   : > { %v4661_v61 = vpack.c.bf16 %v1839_v7, %v1837_v51  ;;  %v1599_v54 = vmul.f32 %v4674_v22, %v4633_v3  ;;  %3331 = vrcp.f32 %v4682_v49  ;;  %v1556_v18 = vmul.f32 %v4658_v53, %v1555_v21  ;;  %v5330_v51 = vld [vmem:[#allocation27_spill] sm:$0xff]  ;;  %v5331_v7 = vld [vmem:[#allocation28_spill] sm:$0xff] }
 0x1b2   : > { %v1113_v23 = vpop.f32.mrf.mxu2  ;;  %v3326_v14 = vpop.eup %3325  ;;  %v1585_v6 = vsub.f32 1.0, %v1584_v28  ;;  %v1571_v10 = vmul.f32 %v4663_v16, %v1570_v9  ;;  %v1579_v55 = vand.u32 2147483648, %v4608_v62  ;;  %v4715_v12 = vadd.f32 %v5331_v7, %v5330_v51  ;;  %v5337_v28 = vld [vmem:[#allocation32_spill] sm:$0xff] }
 0x1b3   : > { %v1162_v11 = vpop.f32.mrf.mxu3  ;;  %v4676_v0 = vpop.f32.mrf.mxu0  ;;  %v4703_v44 = vadd.f32 1.0, %v3326_v14  ;;  %vm4717_vm2 = vcmp.eq.f32.partialorder %v1562_v56, 8.507059e+37  ;;  %vm1588_vm3 = vweird.f32 %v4623_v50  ;;  %v1592_v57 = vand.u32 2147483647, %v4623_v50 }
 0x1b4   : > { %v1163_v19 = vadd.f32 %v1162_v11, %v1113_v23  ;;  %v4678_v13 = vpop.f32.mrf.mxu1  ;;  %v3328_v42 = vpop.eup %3327  ;;  %v1586_v24 = vmul.f32 %v4667_v32, %v1585_v6  ;;  %v1557_v52 = vadd.f32 %v4658_v53, %v1556_v18  ;;  %vm1559_vm4 = vweird.f32 %v4658_v53 }
 0x1b5   : > { %2115 = vmatmul.bf16.gmra.mxu0 %v4582_v36  ;;  %2213 = vmatmul.bf16.gmra.mxu2 %v4582_v36  ;;  %v3330_v4 = vpop.eup %3329  ;;  %v1600_v36 = vsub.f32 1.0, %v1599_v54  ;;  %v4711_v58 = vadd.f32 1.0, %v3328_v42  ;;  %vm1574_vm5 = vweird.f32 %v4663_v16  ;;  %v2906_v26 = vmul.f32 -1.442695, %v5334_v60  ;;  %vm4746_vm6 = vmor %vm1558_vm0, %vm1559_vm4 }
 0x1b6   : > { %v1840_v30 = vmul.f32 %v1808_v2, %v1163_v19  ;;  %2164 = vmatmul.bf16.gmra.mxu1 %v4610_v59  ;;  %v4724_v63 = vadd.f32 1.0, %v3330_v4  ;;  %v1572_v11 = vadd.f32 %v4663_v16, %v1571_v10  ;;  %3333 = vrcp.f32 %v4703_v44  ;;  %vm4762_vm8 = vmor %vm1573_vm1, %vm1574_vm5 }
 0x1b7   : > { %2262 = vmatmul.bf16.gmra.mxu3 %v4610_v59  ;;  %v4734_v23 = vpop.eup %3331  ;;  %v1601_v34 = vmul.f32 %v4674_v22, %v1600_v36  ;;  %v2908_v2 = vmul.f32 -1.442695, %v4707_v17  ;;  %v1594_v29 = vand.u32 2147483648, %v4623_v50  ;;  %v1607_v19 = vand.u32 2147483647, %v4633_v3 }
 0x1b8   : > { %v4684_v1 = vpack.c.bf16 %v1840_v30, %v1838_v38  ;;  %3335 = vrcp.f32 %v4711_v58  ;;  %v2909_v31 = vmul.f32 -1.442695, %v4715_v12  ;;  %v1587_v30 = vadd.f32 %v4667_v32, %v1586_v24 }
 0x1b9   : > { %vm1589_vm7 = vweird.f32 %v4667_v32  ;;  %3337 = vrcp.f32 %v4724_v63  ;;  %v2907_v21 = vmul.f32 -1.442695, %v5337_v28  ;;  %vm1604_vm9 = vweird.f32 %v4674_v22 }
 0x1ba   : > { %v4692_v40 = vpop.f32.mrf.mxu2  ;;  %v1609_v14 = vand.u32 2147483648, %v4633_v3  ;;  %v1614_v42 = vmul.f32 %v4734_v23, %v4682_v49  ;;  %3339 = vpow2.f32 %v2906_v26  ;;  %v1561_v56 = vsel %vm4746_vm6, %v4658_v53, %v1557_v52  ;;  %vm4781_vm11 = vmor %vm1588_vm3, %vm1589_vm7 }
 0x1bb   : > { %v4694_v15 = vpop.f32.mrf.mxu3  ;;  %v4730_v43 = vpop.f32.mrf.mxu0  ;;  %v1576_v62 = vsel %vm4762_vm8, %v4663_v16, %v1572_v11  ;;  %v1602_v6 = vadd.f32 %v4674_v22, %v1601_v34  ;;  %3341 = vpow2.f32 %v2908_v2  ;;  %v1565_v4 = vor.u32 1.1754944e-38, %v1564_v45 }
 0x1bc   : > { %v4732_v48 = vpop.f32.mrf.mxu1  ;;  %vm1578_vm10 = vcmp.eq.f32.partialorder %v1577_v25, 8.507059e+37  ;;  %v1580_v18 = vor.u32 1.1754944e-38, %v1579_v55  ;;  %3343 = vpow2.f32 %v2909_v31  ;;  %v4785_v53 = vpop.eup %3333  ;;  %v1591_v16 = vsel %vm4781_vm11, %v4667_v32, %v1587_v30 }
 0x1bd   : > { %vm1603_vm12 = vweird.f32 %v4633_v3  ;;  %v1624_v45 = vand.u32 2147483648, %v4682_v49  ;;  %3345 = vpow2.f32 %v2907_v21  ;;  %v1566_v50 = vsel %vm4717_vm2, %v1565_v4, %v1561_v56  ;;  %v5346_v56 = vld [vmem:[#allocation30_spill] sm:$0xff] }
 0x1be   : > { %v4792_v36 = vpop.eup %3335  ;;  %v1581_v33 = vsel %vm1578_vm10, %v1580_v18, %v1576_v62  ;;  %v1595_v37 = vor.u32 1.1754944e-38, %v1594_v29  ;;  %vm4798_vm13 = vmor %vm1603_vm12, %vm1604_vm9  ;;  %v1615_v55 = vsub.f32 1.0, %v1614_v42  ;;  %vm1593_vm14 = vcmp.eq.f32.partialorder %v1592_v57, 8.507059e+37  ;;  %v5347_v62 = vld [vmem:[#allocation31_spill] sm:$0xff] }
 0x1bf   : > { %v4802_v32 = vpop.eup %3337  ;;  %v1606_v3 = vsel %vm4798_vm13, %v4674_v22, %v1602_v6  ;;  %vm4807_vm15 = vcmp.eq.f32.partialorder %v1607_v19, 8.507059e+37  ;;  %v1610_v7 = vor.u32 1.1754944e-38, %v1609_v14  ;;  %vm1618_vm0 = vweird.f32 %v4682_v49 }
 0x1c0   : > { %v3340_v59 = vpop.eup %3339  ;;  %v1596_v24 = vsel %vm1593_vm14, %v1595_v37, %v1591_v16  ;;  %v1622_v52 = vand.u32 2147483647, %v4682_v49  ;;  %v1629_v26 = vmul.f32 %v4785_v53, %v4703_v44  ;;  %v1809_v22 = vmul.f32 %v1566_v50, %v3954_v46  ;;  %v5348_v16 = vld [vmem:[#allocation33_spill] sm:$0xff] }
 0x1c1   : > { %v3342_v34 = vpop.eup %3341  ;;  %v1810_v2 = vmul.f32 %v1581_v33, %v5304_v35  ;;  %v4821_v29 = vor.u32 1.1754944e-38, %v1624_v45  ;;  %v1644_v19 = vmul.f32 %v4792_v36, %v4711_v58  ;;  %v1611_v21 = vsel %vm4807_vm15, %v1610_v7, %v1606_v3  ;;  %v5349_v45 = vld [vmem:[#allocation34_spill] sm:$0xff] }
 0x1c2   : > { %v4754_v9 = vpop.f32.mrf.mxu2  ;;  %v3344_v30 = vpop.eup %3343  ;;  %v1616_v46 = vmul.f32 %v4734_v23, %v1615_v55  ;;  %vm1619_vm1 = vweird.f32 %v4734_v23  ;;  %v1659_v35 = vmul.f32 %v4802_v32, %v4724_v63  ;;  %v1811_v27 = vmul.f32 %v1596_v24, %v4522_v20 }
 0x1c3   : > { %v4756_v54 = vpop.f32.mrf.mxu3  ;;  %v4815_v11 = vpop.f32.mrf.mxu0  ;;  %v1637_v14 = vand.u32 2147483647, %v4703_v44  ;;  %v4841_v42 = vadd.f32 1.0, %v3340_v59  ;;  %v4845_v6 = vadd.f32 %v5347_v62, %v5346_v56  ;;  %v1630_v4 = vsub.f32 1.0, %v1629_v26  ;;  %vm4882_vm3 = vmor %vm1618_vm0, %vm1619_vm1 }
 0x1c4   : > { %v4817_v57 = vpop.f32.mrf.mxu1  ;;  %v1639_v18 = vand.u32 2147483648, %v4703_v44  ;;  %v4848_v10 = vadd.f32 1.0, %v3342_v34  ;;  %v4852_v50 = vadd.f32 %v5349_v45, %v5348_v16  ;;  %v1645_v20 = vsub.f32 1.0, %v1644_v19 }
 0x1c5   : > { %2120 = vmatmul.bf16.gmra.mxu0 %v4661_v61  ;;  %2218 = vmatmul.bf16.gmra.mxu2 %v4661_v61  ;;  %v3346_v61 = vpop.eup %3345  ;;  %v4855_v33 = vadd.f32 1.0, %v3344_v30  ;;  %v1070_v37 = vadd.f32 %v4732_v48, %v4730_v43  ;;  %v1617_v25 = vadd.f32 %v4734_v23, %v1616_v46  ;;  %vm1633_vm2 = vweird.f32 %v4703_v44 }
 0x1c6   : > { %2169 = vmatmul.bf16.gmra.mxu1 %v4684_v1  ;;  %v1660_v55 = vsub.f32 1.0, %v1659_v35  ;;  %v4861_v3 = vadd.f32 1.0, %v3346_v61  ;;  %v1168_v51 = vadd.f32 %v4756_v54, %v4754_v9  ;;  %v1652_v7 = vand.u32 2147483647, %v4711_v58  ;;  %v5350_v54 = vld [vmem:[#allocation35_spill] sm:$0xff] }
 0x1c7   : > { %2267 = vmatmul.bf16.gmra.mxu3 %v4684_v1  ;;  %v1812_v1 = vmul.f32 %v1611_v21, %v4545_v39  ;;  %3347 = vrcp.f32 %v4841_v42  ;;  %v2912_v39 = vmul.f32 -1.442695, %v4845_v6  ;;  %v1068_v59 = vadd.f32 %v4678_v13, %v4676_v0 }
 0x1c8   : > { %v1631_v43 = vmul.f32 %v4785_v53, %v1630_v4  ;;  %3349 = vrcp.f32 %v4848_v10  ;;  %v2913_v48 = vmul.f32 -1.442695, %v4852_v50  ;;  %v1166_v24 = vadd.f32 %v4694_v15, %v4692_v40  ;;  %v5353_v40 = vld [vmem:[#allocation36_spill] sm:$0xff] }
 0x1c9   : > { %v1646_v9 = vmul.f32 %v4792_v36, %v1645_v20  ;;  %3351 = vrcp.f32 %v4855_v33  ;;  %v2910_v26 = vmul.f32 -1.442695, %v5350_v54  ;;  %v1843_v34 = vmul.f32 %v1811_v27, %v1070_v37 }
 0x1ca   : > { %v4827_v31 = vpop.f32.mrf.mxu2  ;;  %v1661_v13 = vmul.f32 %v4802_v32, %v1660_v55  ;;  %3353 = vrcp.f32 %v4861_v3  ;;  %v2911_v15 = vmul.f32 -1.442695, %v5353_v40  ;;  %v1844_v19 = vmul.f32 %v1812_v1, %v1168_v51 }
 0x1cb   : > { %v4829_v38 = vpop.f32.mrf.mxu3  ;;  %v4889_v30 = vpop.f32.mrf.mxu0  ;;  %v1621_v46 = vsel %vm4882_vm3, %v4734_v23, %v1617_v25  ;;  %v1654_v35 = vand.u32 2147483648, %v4711_v58  ;;  %3355 = vpow2.f32 %v2912_v39  ;;  %v1841_v61 = vmul.f32 %v1809_v22, %v1068_v59 }
 0x1cc   : > { %v1074_v21 = vpop.f32.mrf.mxu1  ;;  %vm1634_vm4 = vweird.f32 %v4785_v53  ;;  %vm1649_vm5 = vweird.f32 %v4792_v36  ;;  %3357 = vpow2.f32 %v2913_v48  ;;  %v1842_v62 = vmul.f32 %v1810_v2, %v1166_v24 }
 0x1cd   : > { %v4899_v4 = vpop.eup %3347  ;;  %v1632_v16 = vadd.f32 %v4785_v53, %v1631_v43  ;;  %v1647_v45 = vadd.f32 %v4792_v36, %v1646_v9  ;;  %3359 = vpow2.f32 %v2910_v26  ;;  %v1897_v23 = vpack.c.bf16 %v1843_v34, %v1841_v61  ;;  %vm4915_vm8 = vmor %vm1633_vm2, %vm1634_vm4 }
 0x1ce   : > { %v4903_v1 = vpop.eup %3349  ;;  %v1662_v22 = vadd.f32 %v4802_v32, %v1661_v13  ;;  %vm1664_vm6 = vweird.f32 %v4802_v32  ;;  %3361 = vpow2.f32 %v2911_v15  ;;  %v1898_v20 = vpack.c.bf16 %v1844_v19, %v1842_v62 }
 0x1cf   : > { %v4907_v37 = vpop.eup %3351  ;;  %vm1623_vm7 = vcmp.eq.f32.partialorder %v1622_v52, 8.507059e+37  ;;  %vm1648_vm9 = vweird.f32 %v4711_v58  ;;  %v1667_v25 = vand.u32 2147483647, %v4724_v63  ;;  %v1669_v55 = vand.u32 2147483648, %v4724_v63 }
 0x1d0   : > { %v4922_v51 = vpop.eup %3353  ;;  %v1626_v39 = vsel %vm1623_vm7, %v4821_v29, %v1621_v46  ;;  %vm4927_vm10 = vcmp.eq.f32.partialorder %v1637_v14, 8.507059e+37  ;;  %vm4933_vm11 = vmor %vm1648_vm9, %vm1649_vm5  ;;  %vm1663_vm12 = vweird.f32 %v4724_v63  ;;  %v1636_v59 = vsel %vm4915_vm8, %v4785_v53, %v1632_v16 }
 0x1d1   : > { %v3356_v58 = vpop.eup %3355  ;;  %v1640_v29 = vor.u32 1.1754944e-38, %v1639_v18  ;;  %v1651_v14 = vsel %vm4933_vm11, %v4792_v36, %v1647_v45  ;;  %vm4948_vm13 = vmor %vm1663_vm12, %vm1664_vm6  ;;  %v1704_v63 = vmul.f32 %v4903_v1, %v4848_v10  ;;  %vm1653_vm14 = vcmp.eq.f32.partialorder %v1652_v7, 8.507059e+37 }
 0x1d2   : > { %v4895_v27 = vpop.f32.mrf.mxu2  ;;  %v3358_v48 = vpop.eup %3357  ;;  %v1655_v53 = vor.u32 1.1754944e-38, %v1654_v35  ;;  %v1666_v44 = vsel %vm4948_vm13, %v4802_v32, %v1662_v22  ;;  %v1719_v36 = vmul.f32 %v4907_v37, %v4855_v33  ;;  %v1813_v24 = vmul.f32 %v1626_v39, %v5315_v8 }
 0x1d3   : > { %v1172_v56 = vpop.f32.mrf.mxu3  ;;  %v3360_v18 = vpop.eup %3359  ;;  %vm1668_vm15 = vcmp.eq.f32.partialorder %v1667_v25, 8.507059e+37  ;;  %v1670_v9 = vor.u32 1.1754944e-38, %v1669_v55  ;;  %v1674_v26 = vmul.f32 %v4899_v4, %v4841_v42  ;;  %v1641_v7 = vsel %vm4927_vm10, %v1640_v29, %v1636_v59 }
 0x1d4   : > { %v3362_v34 = vpop.eup %3361  ;;  %v1656_v0 = vsel %vm1653_vm14, %v1655_v53, %v1651_v14  ;;  %v1689_v32 = vmul.f32 %v4922_v51, %v4861_v3  ;;  %v4966_v13 = vadd.f32 1.0, %v3356_v58  ;;  %v4968_v15 = vpop.f32.mrf.mxu0  ;;  %v1705_v46 = vsub.f32 1.0, %v1704_v63 }
 0x1d5   : > { %2125 = vmatmul.bf16.gmra.mxu0 %v1897_v23  ;;  %2223 = vmatmul.bf16.gmra.mxu2 %v1897_v23  ;;  %v4970_v19 = vpop.f32.mrf.mxu1  ;;  %v1671_v8 = vsel %vm1668_vm15, %v1670_v9, %v1666_v44  ;;  %v4972_v35 = vadd.f32 1.0, %v3358_v48  ;;  %v1075_v61 = vadd.f32 %v1074_v21, %v4889_v30  ;;  %v1684_v45 = vand.u32 2147483648, %v4841_v42 }
 0x1d6   : > { %2174 = vmatmul.bf16.gmra.mxu1 %v1898_v20  ;;  %v1720_v23 = vsub.f32 1.0, %v1719_v36  ;;  %v4980_v22 = vadd.f32 1.0, %v3360_v18  ;;  %v1815_v2 = vmul.f32 %v1656_v0, %v4646_v41  ;;  %v1675_v25 = vsub.f32 1.0, %v1674_v26 }
 0x1d7   : > { %2272 = vmatmul.bf16.gmra.mxu3 %v1898_v20  ;;  %v1173_v20 = vadd.f32 %v1172_v56, %v4895_v27  ;;  %v4984_v55 = vadd.f32 1.0, %v3362_v34  ;;  %v1073_v39 = vadd.f32 %v4817_v57, %v4815_v11  ;;  %v1816_v30 = vmul.f32 %v1671_v8, %v4654_v5 }
 0x1d8   : > { %v1690_v21 = vsub.f32 1.0, %v1689_v32  ;;  %3363 = vrcp.f32 %v4966_v13  ;;  %v1171_v49 = vadd.f32 %v4829_v38, %v4827_v31  ;;  %v1682_v52 = vand.u32 2147483647, %v4841_v42 }
 0x1d9   : > { %v1706_v27 = vmul.f32 %v4903_v1, %v1705_v46  ;;  %3365 = vrcp.f32 %v4972_v35  ;;  %v1847_v41 = vmul.f32 %v1815_v2, %v1075_v61  ;;  %v1814_v56 = vmul.f32 %v1641_v7, %v5325_v47 }
 0x1da   : > { %v4975_v62 = vpop.f32.mrf.mxu2  ;;  %v1721_v58 = vmul.f32 %v4907_v37, %v1720_v23  ;;  %3367 = vrcp.f32 %v4980_v22  ;;  %v1848_v5 = vmul.f32 %v1816_v30, %v1173_v20  ;;  %v1676_v11 = vmul.f32 %v4899_v4, %v1675_v25 }
 0x1db   : > { %v4977_v16 = vpop.f32.mrf.mxu3  ;;  %3369 = vrcp.f32 %v4984_v55  ;;  %v1845_v57 = vmul.f32 %v1813_v24, %v1073_v39  ;;  %vm1678_vm0 = vweird.f32 %v4841_v42  ;;  %v1685_v31 = vor.u32 1.1754944e-38, %v1684_v45 }
 0x1dc   : > { %v1691_v38 = vmul.f32 %v4922_v51, %v1690_v21  ;;  %v1846_v59 = vmul.f32 %v1814_v56, %v1171_v49  ;;  %vm5002_vm1 = vcmp.eq.f32.partialorder %v1682_v52, 8.507059e+37  ;;  %v1707_v47 = vadd.f32 %v4903_v1, %v1706_v27  ;;  %v1030_v44 = vpop.f32.mrf.mxu0 }
 0x1dd   : > { %vm1708_vm2 = vweird.f32 %v4848_v10  ;;  %vm1709_vm3 = vweird.f32 %v4903_v1  ;;  %v1899_v14 = vpack.c.bf16 %v1847_v41, %v1845_v57  ;;  %v1714_v63 = vand.u32 2147483648, %v4848_v10  ;;  %v1079_v36 = vpop.f32.mrf.mxu1 }
 0x1de   : > { %v5009_v43 = vpop.eup %3363  ;;  %v1722_v48 = vadd.f32 %v4907_v37, %v1721_v58  ;;  %vm1724_vm4 = vweird.f32 %v4907_v37  ;;  %v1900_v53 = vpack.c.bf16 %v1848_v5, %v1846_v59  ;;  %v1677_v24 = vadd.f32 %v4899_v4, %v1676_v11  ;;  %vm5028_vm7 = vmor %vm1708_vm2, %vm1709_vm3 }
 0x1df   : > { %v5014_v18 = vpop.eup %3365  ;;  %vm1679_vm5 = vweird.f32 %v4899_v4  ;;  %v1712_v9 = vand.u32 2147483647, %v4848_v10  ;;  %v1729_v26 = vand.u32 2147483648, %v4855_v33  ;;  %v1692_v32 = vadd.f32 %v4922_v51, %v1691_v38  ;;  %v1862_v10 = vld [vmem:[#allocation2 + $0x68] sm:$0xff] }
 0x1e0   : > { %v5020_v0 = vpop.eup %3367  ;;  %vm1694_vm6 = vweird.f32 %v4922_v51  ;;  %vm1723_vm8 = vweird.f32 %v4855_v33  ;;  %v1727_v46 = vand.u32 2147483647, %v4855_v33  ;;  %vm1693_vm9 = vweird.f32 %v4861_v3  ;;  %vm5053_vm11 = vmor %vm1678_vm0, %vm1679_vm5 }
 0x1e1   : > { %v5034_v61 = vpop.eup %3369  ;;  %v1699_v45 = vand.u32 2147483648, %v4861_v3  ;;  %v1711_v23 = vsel %vm5028_vm7, %v4903_v1, %v1707_v47  ;;  %vm5043_vm10 = vmor %vm1723_vm8, %vm1724_vm4  ;;  %v1764_v20 = vmul.f32 %v5009_v43, %v4966_v13  ;;  %v1697_v1 = vand.u32 2147483647, %v4861_v3 }
 0x1e2   : > { %v1128_v34 = vpop.f32.mrf.mxu2  ;;  %v1715_v2 = vor.u32 1.1754944e-38, %v1714_v63  ;;  %v1726_v25 = vsel %vm5043_vm10, %v4907_v37, %v1722_v48  ;;  %v1779_v39 = vmul.f32 %v5014_v18, %v4972_v35  ;;  %v1681_v42 = vsel %vm5053_vm11, %v4899_v4, %v1677_v24  ;;  %vm5070_vm12 = vmor %vm1693_vm9, %vm1694_vm6 }
 0x1e3   : > { %v1177_v7 = vpop.f32.mrf.mxu3  ;;  %vm1713_vm13 = vcmp.eq.f32.partialorder %v1712_v9, 8.507059e+37  ;;  %v1730_v21 = vor.u32 1.1754944e-38, %v1729_v26  ;;  %v1734_v37 = vmul.f32 %v5020_v0, %v4980_v22  ;;  %v1696_v49 = vsel %vm5070_vm12, %v4922_v51, %v1692_v32 }
 0x1e4   : > { %v1716_v52 = vsel %vm1713_vm13, %v1715_v2, %v1711_v23  ;;  %vm1728_vm14 = vcmp.eq.f32.partialorder %v1727_v46, 8.507059e+37  ;;  %v1749_v4 = vmul.f32 %v5034_v61, %v4984_v55  ;;  %v1700_v27 = vor.u32 1.1754944e-38, %v1699_v45  ;;  %v5089_v48 = vpop.f32.mrf.mxu0 }
 0x1e5   : > { %2130 = vmatmul.bf16.gmra.mxu0 %v1899_v14  ;;  %2228 = vmatmul.bf16.gmra.mxu2 %v1899_v14  ;;  %v1731_v3 = vsel %vm1728_vm14, %v1730_v21, %v1726_v25  ;;  %v1765_v41 = vsub.f32 1.0, %v1764_v20  ;;  %v1080_v56 = vadd.f32 %v1079_v36, %v1030_v44  ;;  %v1686_v58 = vsel %vm5002_vm1, %v1685_v31, %v1681_v42  ;;  %v5091_v29 = vpop.f32.mrf.mxu1 }
 0x1e6   : > { %2179 = vmatmul.bf16.gmra.mxu1 %v1900_v53  ;;  %vm1698_vm15 = vcmp.eq.f32.partialorder %v1697_v1, 8.507059e+37  ;;  %v1780_v5 = vsub.f32 1.0, %v1779_v39  ;;  %v1178_v11 = vadd.f32 %v1177_v7, %v1128_v34  ;;  %v1819_v38 = vmul.f32 %v1716_v52, %v4707_v17 }
 0x1e7   : > { %2277 = vmatmul.bf16.gmra.mxu3 %v1900_v53  ;;  %v1701_v57 = vsel %vm1698_vm15, %v1700_v27, %v1696_v49  ;;  %v1735_v59 = vsub.f32 1.0, %v1734_v37  ;;  %v1078_v51 = vadd.f32 %v4970_v19, %v4968_v15  ;;  %v1820_v47 = vmul.f32 %v1731_v3, %v4715_v12 }
 0x1e8   : > { %v1750_v14 = vsub.f32 1.0, %v1749_v4  ;;  %v1176_v63 = vadd.f32 %v4977_v16, %v4975_v62  ;;  %v1817_v31 = vmul.f32 %v1686_v58, %v5334_v60  ;;  %v1766_v53 = vmul.f32 %v5009_v43, %v1765_v41 }
 0x1e9   : > { %v1851_v44 = vmul.f32 %v1819_v38, %v1080_v56  ;;  %v1818_v15 = vmul.f32 %v1701_v57, %v5337_v28  ;;  %v1781_v12 = vmul.f32 %v5014_v18, %v1780_v5  ;;  %v1852_v19 = vmul.f32 %v1820_v47, %v1178_v11 }
 0x1ea   : > { %v5095_v17 = vpop.f32.mrf.mxu2  ;;  %v1736_v62 = vmul.f32 %v5020_v0, %v1735_v59  ;;  %v1849_v16 = vmul.f32 %v1817_v31, %v1078_v51  ;;  %vm1738_vm0 = vweird.f32 %v4980_v22  ;;  %v1744_v24 = vand.u32 2147483648, %v4980_v22 }
 0x1eb   : > { %v5097_v36 = vpop.f32.mrf.mxu3  ;;  %v1751_v60 = vmul.f32 %v5034_v61, %v1750_v14  ;;  %v1850_v9 = vmul.f32 %v1818_v15, %v1176_v63  ;;  %vm1739_vm1 = vweird.f32 %v5020_v0  ;;  %v1767_v26 = vadd.f32 %v5009_v43, %v1766_v53 }
 0x1ec   : > { %vm1769_vm2 = vweird.f32 %v5009_v43  ;;  %v1901_v28 = vpack.c.bf16 %v1851_v44, %v1849_v16  ;;  %v1774_v34 = vand.u32 2147483648, %v4966_v13  ;;  %v1782_v7 = vadd.f32 %v5014_v18, %v1781_v12  ;;  %vm5136_vm9 = vmor %vm1738_vm0, %vm1739_vm1  ;;  %v1035_v42 = vpop.f32.mrf.mxu0  ;;  %v1859_v12 = vld [vmem:[#allocation2 + $0xd8] sm:$0xff] }
 0x1ed   : > { %vm1784_vm3 = vweird.f32 %v5014_v18  ;;  %v1902_v32 = vpack.c.bf16 %v1852_v19, %v1850_v9  ;;  %v1737_v8 = vadd.f32 %v5020_v0, %v1736_v62  ;;  %vm1768_vm4 = vweird.f32 %v4966_v13  ;;  %v1084_v30 = vpop.f32.mrf.mxu1  ;;  %v1860_v9 = vld [vmem:[#allocation2 + $0x18] sm:$0xff] }
 0x1ee   : > { %v1772_v46 = vand.u32 2147483647, %v4966_v13  ;;  %v1789_v45 = vand.u32 2147483648, %v4972_v35  ;;  %v1752_v23 = vadd.f32 %v5034_v61, %v1751_v60  ;;  %vm1754_vm5 = vweird.f32 %v5034_v61  ;;  %vm5117_vm6 = vmor %vm1768_vm4, %vm1769_vm2 }
 0x1ef   : > { %vm1783_vm7 = vweird.f32 %v4972_v35  ;;  %v1787_v20 = vand.u32 2147483647, %v4972_v35  ;;  %v1742_v33 = vand.u32 2147483647, %v4980_v22  ;;  %v1759_v1 = vand.u32 2147483648, %v4984_v55 }
 0x1f0   : > { %v1771_v13 = vsel %vm5117_vm6, %v5009_v43, %v1767_v26  ;;  %vm5128_vm8 = vmor %vm1783_vm7, %vm1784_vm3  ;;  %vm1753_vm10 = vweird.f32 %v4984_v55  ;;  %v1757_v25 = vand.u32 2147483647, %v4984_v55  ;;  %v1775_v39 = vor.u32 1.1754944e-38, %v1774_v34 }
 0x1f1   : > { %v1786_v43 = vsel %vm5128_vm8, %v5014_v18, %v1782_v7  ;;  %v1741_v22 = vsel %vm5136_vm9, %v5020_v0, %v1737_v8  ;;  %vm5150_vm11 = vmor %vm1753_vm10, %vm1754_vm5  ;;  %vm1773_vm12 = vcmp.eq.f32.partialorder %v1772_v46, 8.507059e+37  ;;  %v1790_v55 = vor.u32 1.1754944e-38, %v1789_v45  ;;  %v1861_v7 = vld [vmem:[#allocation2 + $0x50] sm:$0xff] }
 0x1f2   : > { %v1133_v37 = vpop.f32.mrf.mxu2  ;;  %v1745_v52 = vor.u32 1.1754944e-38, %v1744_v24  ;;  %v1756_v18 = vsel %vm5150_vm11, %v5034_v61, %v1752_v23  ;;  %v1776_v4 = vsel %vm1773_vm12, %v1775_v39, %v1771_v13  ;;  %vm1788_vm13 = vcmp.eq.f32.partialorder %v1787_v20, 8.507059e+37  ;;  %v1863_v13 = vld [vmem:[#allocation2 + $0x30] sm:$0xff] }
 0x1f3   : > { %v1182_v49 = vpop.f32.mrf.mxu3  ;;  %vm1743_vm14 = vcmp.eq.f32.partialorder %v1742_v33, 8.507059e+37  ;;  %v1760_v27 = vor.u32 1.1754944e-38, %v1759_v1  ;;  %v1791_v0 = vsel %vm1788_vm13, %v1790_v55, %v1786_v43  ;;  %v1085_v3 = vadd.f32 %v1084_v30, %v1035_v42  ;;  %v1864_v42 = vld [vmem:[#allocation2 + $0x48] sm:$0xff]  ;;  %v1865_v55 = vld [vmem:[#allocation2 + $0x80] sm:$0xff] }
 0x1f4   : > { %v1746_v41 = vsel %vm1743_vm14, %v1745_v52, %v1741_v22  ;;  %vm1758_vm15 = vcmp.eq.f32.partialorder %v1757_v25, 8.507059e+37  ;;  %v1183_v56 = vadd.f32 %v1182_v49, %v1133_v37  ;;  %v1823_v5 = vmul.f32 %v1776_v4, %v4845_v6 }
 0x1f5   : > { %2135 = vmatmul.bf16.gmra.mxu0 %v1901_v28  ;;  %2233 = vmatmul.bf16.gmra.mxu2 %v1901_v28  ;;  %v1761_v58 = vsel %vm1758_vm15, %v1760_v27, %v1756_v18  ;;  %v1083_v11 = vadd.f32 %v5091_v29, %v5089_v48  ;;  %v1824_v57 = vmul.f32 %v1791_v0, %v4852_v50  ;;  %v1857_v48 = vld [vmem:[#allocation2 + $0xb0] sm:$0xff]  ;;  %v1866_v27 = vld [vmem:[#allocation2 + $0x88] sm:$0xff] }
 0x1f6   : > { %2184 = vmatmul.bf16.gmra.mxu1 %v1902_v32  ;;  %v1181_v61 = vadd.f32 %v5097_v36, %v5095_v17  ;;  %v1821_v38 = vmul.f32 %v1746_v41, %v5350_v54  ;;  %v1855_v59 = vmul.f32 %v1823_v5, %v1085_v3  ;;  %v1822_v51 = vmul.f32 %v1761_v58, %v5353_v40  ;;  %v1858_v54 = vld [vmem:[#allocation2] sm:$0xff] }
 0x1f7   : > { %2282 = vmatmul.bf16.gmra.mxu3 %v1902_v32  ;;  %v1856_v47 = vmul.f32 %v1824_v57, %v1183_v56  ;;  %v1867_v56 = vld [vmem:[#allocation2 + $0xe8] sm:$0xff] }
 0x1f8   : > { %v1853_v14 = vmul.f32 %v1821_v38, %v1083_v11  ;;  %v1854_v63 = vmul.f32 %v1822_v51, %v1181_v61  ;;  %v1868_v38 = vld [vmem:[#allocation2 + $0xb8] sm:$0xff] }
 0x1fa   : > { %v1903_v31 = vpack.c.bf16 %v1855_v59, %v1853_v14  ;;  %v1904_v53 = vpack.c.bf16 %v1856_v47, %v1854_v63  ;;  %v1869_v14 = vld [vmem:[#allocation2 + $0x60] sm:$0xff] }
 0x205   : > { %2140 = vmatmul.bf16.gmra.mxu0 %v1903_v31  ;;  %2238 = vmatmul.bf16.gmra.mxu2 %v1903_v31 }
 0x206   : > { %2189 = vmatmul.bf16.gmra.mxu1 %v1904_v53 }
 0x207   : > { %2287 = vmatmul.bf16.gmra.mxu3 %v1904_v53 }
 0x212   : > { %v2106_v6 = vpop.f32.mrf.mxu0 }
 0x213   : > { %v2155_v50 = vpop.f32.mrf.mxu1 }
 0x214   : > { %v2156_v29 = vadd.f32 %v2155_v50, %v2106_v6  ;;  %v1870_v50 = vld [vmem:[#allocation2 + $0xf0] sm:$0xff] }
 0x216   : > { %v2293_v44 = vadd.f32 %v2156_v29, %v1857_v48 }
 0x218   : > { %2325 = vst [vmem:[#allocation2 + $0xb0] sm:$0xff] %v2293_v44  ;;  %v2204_v17 = vpop.f32.mrf.mxu2 }
 0x21a   : > { %v2253_v36 = vpop.f32.mrf.mxu3  ;;  %v2108_v15 = vpop.f32.mrf.mxu0 }
 0x21b   : > { %v2254_v40 = vadd.f32 %v2253_v36, %v2204_v17  ;;  %v2157_v19 = vpop.f32.mrf.mxu1 }
 0x21c   : > { %v2158_v16 = vadd.f32 %v2157_v19, %v2108_v15 }
 0x21d   : > { %v2294_v62 = vadd.f32 %v2254_v40, %v1858_v54  ;;  %v1871_v54 = vld [vmem:[#allocation2 + $0x8] sm:$0xff] }
 0x21e   : > { %v2295_v24 = vadd.f32 %v2158_v16, %v1859_v12 }
 0x21f   : > { %2326 = vst [vmem:[#allocation2] sm:$0xff] %v2294_v62  ;;  %v1872_v62 = vld [vmem:[#allocation2 + $0x78] sm:$0xff] }
 0x220   : > { %2327 = vst [vmem:[#allocation2 + $0xd8] sm:$0xff] %v2295_v24  ;;  %v2206_v60 = vpop.f32.mrf.mxu2 }
 0x222   : > { %v2255_v26 = vpop.f32.mrf.mxu3  ;;  %v2111_v28 = vpop.f32.mrf.mxu0 }
 0x223   : > { %v2256_v34 = vadd.f32 %v2255_v26, %v2206_v60  ;;  %v2160_v32 = vpop.f32.mrf.mxu1 }
 0x224   : > { %v2161_v46 = vadd.f32 %v2160_v32, %v2111_v28 }
 0x225   : > { %v2296_v8 = vadd.f32 %v2256_v34, %v1860_v9  ;;  %v1873_v9 = vld [vmem:[#allocation2 + $0x38] sm:$0xff] }
 0x226   : > { %v2297_v45 = vadd.f32 %v2161_v46, %v1861_v7 }
 0x227   : > { %2328 = vst [vmem:[#allocation2 + $0x18] sm:$0xff] %v2296_v8  ;;  %v1874_v8 = vld [vmem:[#allocation2 + $0x58] sm:$0xff] }
 0x228   : > { %2329 = vst [vmem:[#allocation2 + $0x50] sm:$0xff] %v2297_v45  ;;  %v2209_v23 = vpop.f32.mrf.mxu2 }
 0x22a   : > { %v2258_v20 = vpop.f32.mrf.mxu3  ;;  %v2113_v33 = vpop.f32.mrf.mxu0 }
 0x22b   : > { %v2259_v1 = vadd.f32 %v2258_v20, %v2209_v23  ;;  %v2162_v2 = vpop.f32.mrf.mxu1 }
 0x22c   : > { %v2163_v25 = vadd.f32 %v2162_v2, %v2113_v33 }
 0x22d   : > { %v2298_v35 = vadd.f32 %v2259_v1, %v1862_v10  ;;  %v1875_v10 = vld [vmem:[#allocation2 + $0x40] sm:$0xff] }
 0x22e   : > { %v2299_v39 = vadd.f32 %v2163_v25, %v1863_v13 }
 0x22f   : > { %2330 = vst [vmem:[#allocation2 + $0x68] sm:$0xff] %v2298_v35  ;;  %v1876_v35 = vld [vmem:[#allocation2 + $0xc8] sm:$0xff] }
 0x230   : > { %2331 = vst [vmem:[#allocation2 + $0x30] sm:$0xff] %v2299_v39  ;;  %v2211_v43 = vpop.f32.mrf.mxu2 }
 0x232   : > { %v2260_v30 = vpop.f32.mrf.mxu3  ;;  %v2116_v22 = vpop.f32.mrf.mxu0 }
 0x233   : > { %v2261_v21 = vadd.f32 %v2260_v30, %v2211_v43  ;;  %v2165_v37 = vpop.f32.mrf.mxu1 }
 0x234   : > { %v2166_v52 = vadd.f32 %v2165_v37, %v2116_v22 }
 0x235   : > { %v2300_v49 = vadd.f32 %v2261_v21, %v1864_v42  ;;  %v1877_v42 = vld [vmem:[#allocation2 + $0xe0] sm:$0xff] }
 0x236   : > { %v2301_v18 = vadd.f32 %v2166_v52, %v1865_v55 }
 0x237   : > { %2332 = vst [vmem:[#allocation2 + $0x48] sm:$0xff] %v2300_v49  ;;  %v1878_v49 = vld [vmem:[#allocation2 + $0x90] sm:$0xff] }
 0x238   : > { %2333 = vst [vmem:[#allocation2 + $0x80] sm:$0xff] %v2301_v18  ;;  %v2214_v4 = vpop.f32.mrf.mxu2 }
 0x23a   : > { %v2263_v0 = vpop.f32.mrf.mxu3  ;;  %v2118_v3 = vpop.f32.mrf.mxu0 }
 0x23b   : > { %v2264_v41 = vadd.f32 %v2263_v0, %v2214_v4  ;;  %v2167_v58 = vpop.f32.mrf.mxu1 }
 0x23c   : > { %v2168_v11 = vadd.f32 %v2167_v58, %v2118_v3 }
 0x23d   : > { %v2302_v5 = vadd.f32 %v2264_v41, %v1866_v27  ;;  %v1879_v27 = vld [vmem:[#allocation2 + $0x70] sm:$0xff] }
 0x23e   : > { %v2303_v57 = vadd.f32 %v2168_v11, %v1867_v56 }
 0x23f   : > { %2334 = vst [vmem:[#allocation2 + $0x88] sm:$0xff] %v2302_v5  ;;  %v1880_v5 = vld [vmem:[#allocation2 + $0xc0] sm:$0xff] }
 0x240   : > { %2335 = vst [vmem:[#allocation2 + $0xe8] sm:$0xff] %v2303_v57  ;;  %v2216_v61 = vpop.f32.mrf.mxu2 }
 0x242   : > { %v2265_v59 = vpop.f32.mrf.mxu3  ;;  %v2121_v51 = vpop.f32.mrf.mxu0 }
 0x243   : > { %v2266_v47 = vadd.f32 %v2265_v59, %v2216_v61  ;;  %v2170_v63 = vpop.f32.mrf.mxu1 }
 0x244   : > { %v2171_v53 = vadd.f32 %v2170_v63, %v2121_v51 }
 0x245   : > { %v2304_v31 = vadd.f32 %v2266_v47, %v1868_v38  ;;  %v1881_v38 = vld [vmem:[#allocation2 + $0xa8] sm:$0xff] }
 0x246   : > { %v2305_v6 = vadd.f32 %v2171_v53, %v1869_v14 }
 0x247   : > { %2336 = vst [vmem:[#allocation2 + $0xb8] sm:$0xff] %v2304_v31  ;;  %v1882_v31 = vld [vmem:[#allocation2 + $0xd0] sm:$0xff] }
 0x248   : > { %2337 = vst [vmem:[#allocation2 + $0x60] sm:$0xff] %v2305_v6  ;;  %v2219_v48 = vpop.f32.mrf.mxu2 }
 0x24a   : > { %v2268_v29 = vpop.f32.mrf.mxu3  ;;  %v2123_v44 = vpop.f32.mrf.mxu0 }
 0x24b   : > { %v2269_v17 = vadd.f32 %v2268_v29, %v2219_v48  ;;  %v2172_v36 = vpop.f32.mrf.mxu1 }
 0x24c   : > { %v2173_v40 = vadd.f32 %v2172_v36, %v2123_v44 }
 0x24d   : > { %v2306_v15 = vadd.f32 %v2269_v17, %v1870_v50  ;;  %v1883_v50 = vld [vmem:[#allocation2 + $0x10] sm:$0xff] }
 0x24e   : > { %v2307_v12 = vadd.f32 %v2173_v40, %v1871_v54 }
 0x24f   : > { %2338 = vst [vmem:[#allocation2 + $0xf0] sm:$0xff] %v2306_v15  ;;  %v1884_v15 = vld [vmem:[#allocation2 + $0x28] sm:$0xff] }
 0x250   : > { %2339 = vst [vmem:[#allocation2 + $0x8] sm:$0xff] %v2307_v12  ;;  %v2221_v19 = vpop.f32.mrf.mxu2 }
 0x252   : > { %v2270_v16 = vpop.f32.mrf.mxu3  ;;  %v2126_v24 = vpop.f32.mrf.mxu0 }
 0x253   : > { %v2271_v60 = vadd.f32 %v2270_v16, %v2221_v19  ;;  %v2175_v26 = vpop.f32.mrf.mxu1 }
 0x254   : > { %v2176_v34 = vadd.f32 %v2175_v26, %v2126_v24 }
 0x255   : > { %v2308_v28 = vadd.f32 %v2271_v60, %v1872_v62  ;;  %v1885_v62 = vld [vmem:[#allocation2 + $0xa0] sm:$0xff] }
 0x256   : > { %v2309_v7 = vadd.f32 %v2176_v34, %v1873_v9 }
 0x257   : > { %2340 = vst [vmem:[#allocation2 + $0x78] sm:$0xff] %v2308_v28  ;;  %v1886_v28 = vld [vmem:[#allocation2 + $0xf8] sm:$0xff] }
 0x258   : > { %2341 = vst [vmem:[#allocation2 + $0x38] sm:$0xff] %v2309_v7  ;;  %v2224_v32 = vpop.f32.mrf.mxu2 }
 0x25a   : > { %v2273_v46 = vpop.f32.mrf.mxu3  ;;  %v2128_v45 = vpop.f32.mrf.mxu0 }
 0x25b   : > { %v2274_v23 = vadd.f32 %v2273_v46, %v2224_v32  ;;  %v2177_v20 = vpop.f32.mrf.mxu1 }
 0x25c   : > { %v2178_v1 = vadd.f32 %v2177_v20, %v2128_v45 }
 0x25d   : > { %v2310_v33 = vadd.f32 %v2274_v23, %v1874_v8  ;;  %v1887_v8 = vld [vmem:[#allocation2 + $0x20] sm:$0xff] }
 0x25e   : > { %v2311_v13 = vadd.f32 %v2178_v1, %v1875_v10 }
 0x25f   : > { %2342 = vst [vmem:[#allocation2 + $0x58] sm:$0xff] %v2310_v33  ;;  %v1888_v33 = vld [vmem:[#allocation2 + $0x98] sm:$0xff] }
 0x260   : > { %2343 = vst [vmem:[#allocation2 + $0x40] sm:$0xff] %v2311_v13  ;;  %v2226_v2 = vpop.f32.mrf.mxu2 }
 0x262   : > { %v2275_v25 = vpop.f32.mrf.mxu3  ;;  %v2131_v39 = vpop.f32.mrf.mxu0 }
 0x263   : > { %v2276_v43 = vadd.f32 %v2275_v25, %v2226_v2  ;;  %v2180_v30 = vpop.f32.mrf.mxu1 }
 0x264   : > { %v2181_v21 = vadd.f32 %v2180_v30, %v2131_v39 }
 0x265   : > { %v2312_v22 = vadd.f32 %v2276_v43, %v1876_v35 }
 0x266   : > { %v2313_v55 = vadd.f32 %v2181_v21, %v1877_v42 }
 0x267   : > { %2344 = vst [vmem:[#allocation2 + $0xc8] sm:$0xff] %v2312_v22 }
 0x268   : > { %2345 = vst [vmem:[#allocation2 + $0xe0] sm:$0xff] %v2313_v55  ;;  %v2229_v37 = vpop.f32.mrf.mxu2 }
 0x26a   : > { %v2278_v52 = vpop.f32.mrf.mxu3  ;;  %v2133_v18 = vpop.f32.mrf.mxu0 }
 0x26b   : > { %v2279_v4 = vadd.f32 %v2278_v52, %v2229_v37  ;;  %v2182_v0 = vpop.f32.mrf.mxu1 }
 0x26c   : > { %v2183_v41 = vadd.f32 %v2182_v0, %v2133_v18 }
 0x26d   : > { %v2314_v3 = vadd.f32 %v2279_v4, %v1878_v49 }
 0x26e   : > { %v2315_v56 = vadd.f32 %v2183_v41, %v1879_v27 }
 0x26f   : > { %2346 = vst [vmem:[#allocation2 + $0x90] sm:$0xff] %v2314_v3 }
 0x270   : > { %2347 = vst [vmem:[#allocation2 + $0x70] sm:$0xff] %v2315_v56  ;;  %v2231_v58 = vpop.f32.mrf.mxu2 }
 0x272   : > { %v2280_v11 = vpop.f32.mrf.mxu3  ;;  %v2136_v57 = vpop.f32.mrf.mxu0 }
 0x273   : > { %v2281_v61 = vadd.f32 %v2280_v11, %v2231_v58  ;;  %v2185_v59 = vpop.f32.mrf.mxu1 }
 0x274   : > { %v2186_v47 = vadd.f32 %v2185_v59, %v2136_v57 }
 0x275   : > { %v2316_v51 = vadd.f32 %v2281_v61, %v1880_v5 }
 0x276   : > { %v2317_v14 = vadd.f32 %v2186_v47, %v1881_v38 }
 0x277   : > { %2348 = vst [vmem:[#allocation2 + $0xc0] sm:$0xff] %v2316_v51 }
 0x278   : > { %2349 = vst [vmem:[#allocation2 + $0xa8] sm:$0xff] %v2317_v14  ;;  %v2234_v63 = vpop.f32.mrf.mxu2 }
 0x27a   : > { %v2283_v53 = vpop.f32.mrf.mxu3  ;;  %v2138_v6 = vpop.f32.mrf.mxu0 }
 0x27b   : > { %v2284_v48 = vadd.f32 %v2283_v53, %v2234_v63  ;;  %v2187_v29 = vpop.f32.mrf.mxu1 }
 0x27c   : > { %v2188_v17 = vadd.f32 %v2187_v29, %v2138_v6 }
 0x27d   : > { %v2318_v44 = vadd.f32 %v2284_v48, %v1882_v31 }
 0x27e   : > { %v2319_v54 = vadd.f32 %v2188_v17, %v1883_v50 }
 0x27f   : > { %2350 = vst [vmem:[#allocation2 + $0xd0] sm:$0xff] %v2318_v44 }
 0x280   : > { %2351 = vst [vmem:[#allocation2 + $0x10] sm:$0xff] %v2319_v54  ;;  %v2236_v36 = vpop.f32.mrf.mxu2 }
 0x282   : > { %v2285_v40 = vpop.f32.mrf.mxu3  ;;  %v2141_v12 = vpop.f32.mrf.mxu0 }
 0x283   : > { %v2286_v19 = vadd.f32 %v2285_v40, %v2236_v36  ;;  %v2190_v16 = vpop.f32.mrf.mxu1 }
 0x284   : > { %v2191_v60 = vadd.f32 %v2190_v16, %v2141_v12 }
 0x285   : > { %v2320_v24 = vadd.f32 %v2286_v19, %v1884_v15 }
 0x286   : > { %v2321_v9 = vadd.f32 %v2191_v60, %v1885_v62 }
 0x287   : > { %2352 = vst [vmem:[#allocation2 + $0x28] sm:$0xff] %v2320_v24 }
 0x288   : > { %2353 = vst [vmem:[#allocation2 + $0xa0] sm:$0xff] %v2321_v9  ;;  %v2239_v26 = vpop.f32.mrf.mxu2 }
 0x28a   : > { %v2288_v34 = vpop.f32.mrf.mxu3  ;;  %v2143_v32 = vpop.f32.mrf.mxu0 }
 0x28b   : > { %v2289_v7 = vadd.f32 %v2288_v34, %v2239_v26  ;;  %v2192_v46 = vpop.f32.mrf.mxu1 }
 0x28c   : > { %v2193_v23 = vadd.f32 %v2192_v46, %v2143_v32 }
 0x28d   : > { %v2322_v45 = vadd.f32 %v2289_v7, %v1886_v28 }
 0x28e   : > { %v2323_v10 = vadd.f32 %v2193_v23, %v1887_v8 }
 0x28f   : > { %2354 = vst [vmem:[#allocation2 + $0xf8] sm:$0xff] %v2322_v45 }
 0x290   : > { %2355 = vst [vmem:[#allocation2 + $0x20] sm:$0xff] %v2323_v10  ;;  %v2241_v20 = vpop.f32.mrf.mxu2 }
 0x292   : > { %v2290_v1 = vpop.f32.mrf.mxu3 }
 0x293   : > { %v2291_v13 = vadd.f32 %v2290_v1, %v2241_v20  ;;  %2360 = sbr.rel (%p3042_p2) target bundleno = 683 (0x2ab), region = 48 }
 0x295   : > { %v2324_v2 = vadd.f32 %v2291_v13, %v1888_v33 }
 0x297   : > { %2356 = vst [vmem:[#allocation2 + $0x98] sm:$0xff] %v2324_v2 }
 0x298   : > { %v2361_v35 = vld [vmem:[#allocation2 + $0xb0] sm:$0xff]  ;;  %v2362_v25 = vld [vmem:[#allocation2] sm:$0xff]  ;;  %v2363_v39 = vld [vmem:[#allocation2 + $0xd8] sm:$0xff] }
 0x299   : > { %v2393_v43 = vpack.c.bf16 %v2362_v25, %v2361_v35  ;;  %v2364_v42 = vld [vmem:[#allocation2 + $0x18] sm:$0xff]  ;;  %v2365_v30 = vld [vmem:[#allocation2 + $0x50] sm:$0xff]  ;;  %v2366_v22 = vld [vmem:[#allocation2 + $0x68] sm:$0xff] }
 0x29a   : > { %v2394_v21 = vpack.c.bf16 %v2364_v42, %v2363_v39  ;;  %v2395_v55 = vpack.c.bf16 %v2366_v22, %v2365_v30  ;;  %v2367_v37 = vld [vmem:[#allocation2 + $0x30] sm:$0xff]  ;;  %v2368_v49 = vld [vmem:[#allocation2 + $0x48] sm:$0xff]  ;;  %v2369_v52 = vld [vmem:[#allocation2 + $0x80] sm:$0xff] }
 0x29b   : > { %2409 = vst [vmem:[%s3642_s4] sm:$0xff] %v2393_v43  ;;  %v2396_v18 = vpack.c.bf16 %v2368_v49, %v2367_v37  ;;  %v2370_v4 = vld [vmem:[#allocation2 + $0x88] sm:$0xff]  ;;  %v2372_v0 = vld [vmem:[#allocation2 + $0xb8] sm:$0xff]  ;;  %v2373_v56 = vld [vmem:[#allocation2 + $0x60] sm:$0xff] }
 0x29c   : > { %v2371_v27 = vld [vmem:[#allocation2 + $0xe8] sm:$0xff]  ;;  %2410 = vst [vmem:[%s3642_s4 + $0x8] sm:$0xff] %v2394_v21  ;;  %v2397_v3 = vpack.c.bf16 %v2370_v4, %v2369_v52  ;;  %v2374_v58 = vld [vmem:[#allocation2 + $0xf0] sm:$0xff]  ;;  %v2376_v57 = vld [vmem:[#allocation2 + $0x78] sm:$0xff] }
 0x29d   : > { %v2398_v41 = vpack.c.bf16 %v2372_v0, %v2371_v27  ;;  %v2375_v5 = vld [vmem:[#allocation2 + $0x8] sm:$0xff]  ;;  %2411 = vst [vmem:[%s3642_s4 + $0x10] sm:$0xff] %v2395_v55  ;;  %v2399_v11 = vpack.c.bf16 %v2374_v58, %v2373_v56  ;;  %v2377_v61 = vld [vmem:[#allocation2 + $0x38] sm:$0xff]  ;;  %v2379_v51 = vld [vmem:[#allocation2 + $0x40] sm:$0xff] }
 0x29e   : > { %v2378_v38 = vld [vmem:[#allocation2 + $0x58] sm:$0xff]  ;;  %2412 = vst [vmem:[%s3642_s4 + $0x18] sm:$0xff] %v2396_v18  ;;  %v2400_v59 = vpack.c.bf16 %v2376_v57, %v2375_v5  ;;  %v2380_v47 = vld [vmem:[#allocation2 + $0xc8] sm:$0xff]  ;;  %v2381_v14 = vld [vmem:[#allocation2 + $0xe0] sm:$0xff] }
 0x29f   : > { %2413 = vst [vmem:[%s3642_s4 + $0x20] sm:$0xff] %v2397_v3  ;;  %v2401_v63 = vpack.c.bf16 %v2378_v38, %v2377_v61  ;;  %v2382_v31 = vld [vmem:[#allocation2 + $0x90] sm:$0xff]  ;;  %v2384_v6 = vld [vmem:[#allocation2 + $0xc0] sm:$0xff]  ;;  %v2402_v48 = vpack.c.bf16 %v2380_v47, %v2379_v51  ;;  %v2385_v50 = vld [vmem:[#allocation2 + $0xa8] sm:$0xff] }
 0x2a0   : > { %v2383_v53 = vld [vmem:[#allocation2 + $0x70] sm:$0xff]  ;;  %2414 = vst [vmem:[%s3642_s4 + $0x28] sm:$0xff] %v2398_v41  ;;  %v2403_v44 = vpack.c.bf16 %v2382_v31, %v2381_v14  ;;  %v2388_v54 = vld [vmem:[#allocation2 + $0x28] sm:$0xff]  ;;  %v2389_v15 = vld [vmem:[#allocation2 + $0xa0] sm:$0xff] }
 0x2a1   : > { %v2386_v29 = vld [vmem:[#allocation2 + $0xd0] sm:$0xff]  ;;  %2415 = vst [vmem:[%s3642_s4 + $0x30] sm:$0xff] %v2399_v11  ;;  %v2404_v36 = vpack.c.bf16 %v2384_v6, %v2383_v53  ;;  %v2390_v40 = vld [vmem:[#allocation2 + $0xf8] sm:$0xff]  ;;  %v2391_v19 = vld [vmem:[#allocation2 + $0x20] sm:$0xff] }
 0x2a2   : > { %v2387_v17 = vld [vmem:[#allocation2 + $0x10] sm:$0xff]  ;;  %2416 = vst [vmem:[%s3642_s4 + $0x38] sm:$0xff] %v2400_v59  ;;  %v2405_v12 = vpack.c.bf16 %v2386_v29, %v2385_v50  ;;  %v2392_v62 = vld [vmem:[#allocation2 + $0x98] sm:$0xff]  ;;  %v2407_v24 = vpack.c.bf16 %v2390_v40, %v2389_v15 }
 0x2a3   : > { %2417 = vst [vmem:[%s3642_s4 + $0x40] sm:$0xff] %v2401_v63  ;;  %v2406_v16 = vpack.c.bf16 %v2388_v54, %v2387_v17  ;;  %v2408_v60 = vpack.c.bf16 %v2392_v62, %v2391_v19 }
 0x2a4   : > { %2418 = vst [vmem:[%s3642_s4 + $0x48] sm:$0xff] %v2402_v48 }
 0x2a5   : > { %2419 = vst [vmem:[%s3642_s4 + $0x50] sm:$0xff] %v2403_v44 }
 0x2a6   : > { %2420 = vst [vmem:[%s3642_s4 + $0x58] sm:$0xff] %v2404_v36 }
 0x2a7   : > { %2421 = vst [vmem:[%s3642_s4 + $0x60] sm:$0xff] %v2405_v12 }
 0x2a8   : > { %2422 = vst [vmem:[%s3642_s4 + $0x68] sm:$0xff] %v2406_v16 }
 0x2a9   : > { %2423 = vst [vmem:[%s3642_s4 + $0x70] sm:$0xff] %v2407_v24 }
 0x2aa   : > { %2424 = vst [vmem:[%s3642_s4 + $0x78] sm:$0xff] %v2408_v60 }
 0x2ab PF: > { %s19_s19 = sadd.s32 1, %s3501_s19   ;;  %s5380_s28 = sld [smem:[#allocation9_spill]] }
 0x2ac   : > { %p16_p3 = scmp.ge.s32.totalorder %s19_s19, 6   ;;  %s5381_s12 = smov %s3477_s13 }
 0x2ad   : > { %s5382_s13 = smov %s3481_s14  ;;  %s5383_s14 = smov %s3586_s26 }
 0x2ae   : > { %s5384_s15 = smov %s3493_s17  ;;  %s5385_s16 = smov %s3497_s18 }
 0x2af   : > { %s5386_s17 = smov %s5389_s21  ;;  %18 = sbr.rel (!%p16_p3) target bundleno = 9 (0x9), region = 96 }
 0x2b1   : > { %s5387_s18 = smov %s5380_s28 }
 0x2b4   :  { %2449 = vsyncpa [#allocation4], 1 }
 0x2b5   :  { %2451 = vsyncpa [#allocation4 + $0x1], 1 }
 0x2b6   :  { %2452 = vsyncpa [#allocation6], 1 }
 0x2b7   :  { %2454 = vsyncpa [#allocation6 + $0x1], 1 }

</bundles_post_ra>
